<compile_context>
chip_gen: v5e
topology: v5e:2x2
jax: 0.10.0
libtpu: 0.0.40
codegen_flags: <defaults>
</compile_context>

<pallas_src>
import jax
import jax.numpy as jnp
from jax import lax
from jax.experimental import pallas as pl
from jax.experimental.pallas import tpu as pltpu

K = 5
DILATIONS = (1, 4, 8, 16)
N_BRANCH = len(DILATIONS)
HALO = 64   # per-side halo, rounded up from the true max (32) so every window is lane-aligned
# 13 distinct tap offsets shared by the 20 (dilation, tap) pairs.
REL_OFFSETS = tuple(sorted({d * (k - 2) for d in DILATIONS for k in range(K)}))
N_OFF = len(REL_OFFSETS)


def _round_up(v, m):
    return (v + m - 1) // m * m


def dilation_block(x, weights, biases, *, tile_l=512, compute_dtype=jnp.bfloat16):
    """Fused DilationBlock forward.

    x:       (N, C_in, L) float32
    weights: (4, C_out, C_in, K)   (PyTorch Conv1d weight layout, one branch per leading index)
    biases:  (4, C_out)
    returns  (N, 4*C_out, L) float32 == concat([relu(conv_d(x)) for d in (1,4,8,16)], axis=1)
    """
    n, c_in, length = x.shape
    n_br, c_out, c_in_w, k = weights.shape
    assert n_br == N_BRANCH and k == K and c_in_w == c_in
    cdt = jnp.dtype(compute_dtype)

    # --- tiling over L ------------------------------------------------------------------
    tile_l = max(128, (int(tile_l) // 128) * 128)
    tile_l = min(tile_l, _round_up(length, 128))
    l_pad = _round_up(length, tile_l)
    num_l = l_pad // tile_l

    # --- channel padding (sublane alignment of every slab row-block) ---------------------
    sub = 16 if cdt.itemsize == 2 else 8
    c_in_p = _round_up(c_in, sub)

    # --- pad x once: zero halo (>=32 needed, 64 for lane alignment) + length tail --------
    x_pad = jnp.pad(x, ((0, 0), (0, c_in_p - c_in), (HALO, (l_pad - length) + HALO)))
    x_pad = x_pad.astype(cdt)

    # --- pack weights: (4*C_out, 13*C_in_p), branch-major rows, offset-major columns -----
    w_p = jnp.pad(weights, ((0, 0), (0, 0), (0, c_in_p - c_in), (0, 0))).astype(jnp.float32)
    off_idx = {o: r for r, o in enumerate(REL_OFFSETS)}
    c_tot = N_BRANCH * c_out
    w_big = jnp.zeros((c_tot, N_OFF * c_in_p), jnp.float32)
    for j, d in enumerate(DILATIONS):
        for kk in range(K):
            r = off_idx[d * (kk - 2)]
            w_big = w_big.at[j * c_out:(j + 1) * c_out,
                             r * c_in_p:(r + 1) * c_in_p].set(w_p[j, :, :, kk])
    w_big = w_big.astype(cdt)
    b_big = biases.reshape(c_tot, 1).astype(jnp.float32)

    dot_precision = lax.Precision.HIGHEST if cdt == jnp.dtype(jnp.float32) else None

    def kernel(xa_ref, xb_ref, w_ref, b_ref, o_ref, xwin_ref, slab_ref):
        # Stitch the (tile_l + 128)-wide halo window in VMEM: two aligned full-width stores.
        xwin_ref[:, :tile_l] = xa_ref[0]
        xwin_ref[:, tile_l:] = xb_ref[0]
        # Deduplicated im2col slab: one shifted copy per DISTINCT tap offset (13, not 20).
        # Each RHS slice is consumed immediately -> no large live value across the loop.
        for r, off in enumerate(REL_OFFSETS):
            lo = HALO + off                                   # static, in [32, 96]
            slab_ref[r * c_in_p:(r + 1) * c_in_p, :] = xwin_ref[:, lo:lo + tile_l]
        # Single MXU contraction computes all 4 dilation branches; f32 accumulation.
        y = jnp.dot(w_ref[...], slab_ref[...],
                    preferred_element_type=jnp.float32, precision=dot_precision)
        y = y + b_ref[...]                                    # (4*C_out, 1) broadcast over L
        o_ref[0, :, :] = jnp.maximum(y, 0.0).astype(o_ref.dtype)   # ReLU, one aligned store

    # --- VMEM budget hint (size tile_l so this stays <= ~48 MiB on v7x's 64 MiB/TC) ------
    isz = cdt.itemsize
    est = (2 * c_in_p * tile_l * isz                  # main input block (double-buffered)
           + 2 * c_in_p * 2 * HALO * isz              # halo block (double-buffered)
           + 2 * c_tot * N_OFF * c_in_p * isz         # packed weights
           + 2 * c_tot * 4                            # bias
           + 2 * c_tot * tile_l * 4                   # output tile (double-buffered)
           + c_in_p * (tile_l + 2 * HALO) * isz       # window scratch
           + N_OFF * c_in_p * tile_l * isz)           # im2col slab scratch
    vmem_limit = int(min(100 * 2 ** 20, max(32 * 2 ** 20, 1.5 * est)))

    lb = tile_l // 128
    out = pl.pallas_call(
        kernel,
        out_shape=jax.ShapeDtypeStruct((n, c_tot, l_pad), jnp.float32),
        grid=(n, num_l),
        in_specs=[
            pl.BlockSpec((1, c_in_p, tile_l), lambda b, l: (b, 0, l)),            # main block
            pl.BlockSpec((1, c_in_p, 2 * HALO), lambda b, l: (b, 0, (l + 1) * lb)),  # right halo
            pl.BlockSpec((c_tot, N_OFF * c_in_p), lambda b, l: (0, 0)),            # weights
            pl.BlockSpec((c_tot, 1), lambda b, l: (0, 0)),                          # bias
        ],
        out_specs=pl.BlockSpec((1, c_tot, tile_l), lambda b, l: (b, 0, l)),
        scratch_shapes=[
            pltpu.VMEM((c_in_p, tile_l + 2 * HALO), cdt),    # stitched halo window
            pltpu.VMEM((N_OFF * c_in_p, tile_l), cdt),       # deduplicated im2col slab
        ],
        compiler_params=pltpu.CompilerParams(
            dimension_semantics=("parallel", "parallel"),
            vmem_limit_bytes=vmem_limit),
    )(x_pad, x_pad, w_big, b_big)
    return out[:, :, :length]


def _reference(x, weights, biases, precision=None):
    """Pure-JAX reference via lax.conv_general_dilated (PyTorch Conv1d semantics)."""
    outs = []
    for j, d in enumerate(DILATIONS):
        y = lax.conv_general_dilated(
            x, weights[j],
            window_strides=(1,),
            padding=[(2 * d, 2 * d)],
            rhs_dilation=(d,),
            dimension_numbers=("NCH", "OIH", "NCH"),
            precision=precision)
        y = y + biases[j][None, :, None]
        outs.append(jnp.maximum(y, 0.0))
    return jnp.concatenate(outs, axis=1)


if __name__ == "__main__":
    # batch=2, in_channels=4, out_channels=4, L=1000 (not a multiple of 128 -> exercises the
    # wrapper tail padding + output slicing; tile_l=512 -> 2 L-tiles, grid (2, 2)).
    N, C_IN, C_OUT, L = 2, 4, 4, 1000

    key = jax.random.PRNGKey(0)
    kx, kw, kb = jax.random.split(key, 3)

    x = jax.random.normal(kx, (N, C_IN, L), dtype=jnp.float32)
    scale = 1.0 / (C_IN * K) ** 0.5                      # PyTorch Conv1d default init scale
    w = jax.random.uniform(kw, (N_BRANCH, C_OUT, C_IN, K), jnp.float32, -scale, scale)
    b = jax.random.uniform(kb, (N_BRANCH, C_OUT), jnp.float32, -scale, scale)

    ref = _reference(x, w, b, precision=lax.Precision.HIGHEST)

    # f32 path: tight tolerance — validates the offset math / block-diagonal packing.
    out_f32 = jax.block_until_ready(
        dilation_block(x, w, b, tile_l=512, compute_dtype=jnp.float32))
    assert out_f32.shape == (N, N_BRANCH * C_OUT, L), out_f32.shape
    err32 = float(jnp.max(jnp.abs(out_f32 - ref)))
    assert jnp.allclose(out_f32, ref, rtol=1e-3, atol=1e-3), f"f32 mismatch, max err {err32}"

    # bf16 fast path (default): MXU-native dtype with f32 accumulation -> relaxed tolerance.
    out_bf16 = jax.block_until_ready(dilation_block(x, w, b, tile_l=512))
    assert out_bf16.shape == (N, N_BRANCH * C_OUT, L), out_bf16.shape
    err16 = float(jnp.max(jnp.abs(out_bf16 - ref)))
    assert jnp.allclose(out_bf16, ref, rtol=5e-2, atol=5e-2), f"bf16 mismatch, max err {err16}"

    print("KERNEL_OK")
</pallas_src>

<mosaic_0001>
module attributes {stable_mosaic.version = 11 : i64} {
  func.func @kernel(%arg0: i32, %arg1: i32, %arg2: memref<1x8x512xf32, #tpu.memory_space<vmem>>, %arg3: memref<1x8x128xf32, #tpu.memory_space<vmem>>, %arg4: memref<16x104xf32, #tpu.memory_space<vmem>>, %arg5: memref<16x1xf32, #tpu.memory_space<vmem>>, %arg6: memref<1x16x512xf32, #tpu.memory_space<vmem>>, %arg7: memref<8x640xf32, #tpu.memory_space<vmem>>, %arg8: memref<104x512xf32, #tpu.memory_space<vmem>>) attributes {dimension_semantics = [#tpu.dimension_semantics<parallel>, #tpu.dimension_semantics<parallel>], iteration_bounds = array<i64: 2, 2>, scalar_prefetch = 0 : i64, scratch_operands = 2 : i64, tpu.core_type = #tpu.core_type<tc>, window_params = [{transform_indices = @transform_0, window_bounds = array<i64: 1, 8, 512>}, {transform_indices = @transform_1, window_bounds = array<i64: 1, 8, 128>}, {pipeline_mode = #tpu.pipeline_mode<synchronous>, transform_indices = @transform_2, window_bounds = array<i64: 16, 104>}, {pipeline_mode = #tpu.pipeline_mode<synchronous>, transform_indices = @transform_3, window_bounds = array<i64: 16, 1>}, {transform_indices = @transform_4, window_bounds = array<i64: 1, 16, 512>}]} {
    %c0 = arith.constant 0 : index
    %c0_0 = arith.constant 0 : index
    %c0_1 = arith.constant 0 : index
    %0 = vector.load %arg2[%c0, %c0_0, %c0_1] : memref<1x8x512xf32, #tpu.memory_space<vmem>>, vector<1x8x512xf32>
    %1 = vector.shape_cast %0 : vector<1x8x512xf32> to vector<8x512xf32>
    %c0_2 = arith.constant 0 : index
    %c0_3 = arith.constant 0 : index
    %2 = vector.load %arg7[%c0_2, %c0_3] : memref<8x640xf32, #tpu.memory_space<vmem>>, vector<8x512xf32>
    tpu.vector_store %arg7[%c0_2, %c0_3], %1 {strides = array<i32>} : memref<8x640xf32, #tpu.memory_space<vmem>>, vector<8x512xf32>,
    %c0_4 = arith.constant 0 : index
    %c0_5 = arith.constant 0 : index
    %c0_6 = arith.constant 0 : index
    %3 = vector.load %arg3[%c0_4, %c0_5, %c0_6] : memref<1x8x128xf32, #tpu.memory_space<vmem>>, vector<1x8x128xf32>
    %4 = vector.shape_cast %3 : vector<1x8x128xf32> to vector<8x128xf32>
    %c0_7 = arith.constant 0 : index
    %c512 = arith.constant 512 : index
    %5 = vector.load %arg7[%c0_7, %c512] : memref<8x640xf32, #tpu.memory_space<vmem>>, vector<8x128xf32>
    tpu.vector_store %arg7[%c0_7, %c512], %4 {strides = array<i32>} : memref<8x640xf32, #tpu.memory_space<vmem>>, vector<8x128xf32>,
    %c0_8 = arith.constant 0 : index
    %c32 = arith.constant 32 : index
    %6 = vector.load %arg7[%c0_8, %c32] : memref<8x640xf32, #tpu.memory_space<vmem>>, vector<8x512xf32>
    %c0_9 = arith.constant 0 : index
    %c0_10 = arith.constant 0 : index
    %7 = vector.load %arg8[%c0_9, %c0_10] : memref<104x512xf32, #tpu.memory_space<vmem>>, vector<8x512xf32>
    tpu.vector_store %arg8[%c0_9, %c0_10], %6 {strides = array<i32>} : memref<104x512xf32, #tpu.memory_space<vmem>>, vector<8x512xf32>,
    %c0_11 = arith.constant 0 : index
    %c48 = arith.constant 48 : index
    %8 = vector.load %arg7[%c0_11, %c48] : memref<8x640xf32, #tpu.memory_space<vmem>>, vector<8x512xf32>
    %c8 = arith.constant 8 : index
    %c0_12 = arith.constant 0 : index
    %9 = vector.load %arg8[%c8, %c0_12] : memref<104x512xf32, #tpu.memory_space<vmem>>, vector<8x512xf32>
    tpu.vector_store %arg8[%c8, %c0_12], %8 {strides = array<i32>} : memref<104x512xf32, #tpu.memory_space<vmem>>, vector<8x512xf32>,
    %c0_13 = arith.constant 0 : index
    %c56 = arith.constant 56 : index
    %10 = vector.load %arg7[%c0_13, %c56] : memref<8x640xf32, #tpu.memory_space<vmem>>, vector<8x512xf32>
    %c16 = arith.constant 16 : index
    %c0_14 = arith.constant 0 : index
    %11 = vector.load %arg8[%c16, %c0_14] : memref<104x512xf32, #tpu.memory_space<vmem>>, vector<8x512xf32>
    tpu.vector_store %arg8[%c16, %c0_14], %10 {strides = array<i32>} : memref<104x512xf32, #tpu.memory_space<vmem>>, vector<8x512xf32>,
    %c0_15 = arith.constant 0 : index
    %c60 = arith.constant 60 : index
    %12 = vector.load %arg7[%c0_15, %c60] : memref<8x640xf32, #tpu.memory_space<vmem>>, vector<8x512xf32>
    %c24 = arith.constant 24 : index
    %c0_16 = arith.constant 0 : index
    %13 = vector.load %arg8[%c24, %c0_16] : memref<104x512xf32, #tpu.memory_space<vmem>>, vector<8x512xf32>
    tpu.vector_store %arg8[%c24, %c0_16], %12 {strides = array<i32>} : memref<104x512xf32, #tpu.memory_space<vmem>>, vector<8x512xf32>,
    %c0_17 = arith.constant 0 : index
    %c62 = arith.constant 62 : index
    %14 = vector.load %arg7[%c0_17, %c62] : memref<8x640xf32, #tpu.memory_space<vmem>>, vector<8x512xf32>
    %c32_18 = arith.constant 32 : index
    %c0_19 = arith.constant 0 : index
    %15 = vector.load %arg8[%c32_18, %c0_19] : memref<104x512xf32, #tpu.memory_space<vmem>>, vector<8x512xf32>
    tpu.vector_store %arg8[%c32_18, %c0_19], %14 {strides = array<i32>} : memref<104x512xf32, #tpu.memory_space<vmem>>, vector<8x512xf32>,
    %c0_20 = arith.constant 0 : index
    %c63 = arith.constant 63 : index
    %16 = vector.load %arg7[%c0_20, %c63] : memref<8x640xf32, #tpu.memory_space<vmem>>, vector<8x512xf32>
    %c40 = arith.constant 40 : index
    %c0_21 = arith.constant 0 : index
    %17 = vector.load %arg8[%c40, %c0_21] : memref<104x512xf32, #tpu.memory_space<vmem>>, vector<8x512xf32>
    tpu.vector_store %arg8[%c40, %c0_21], %16 {strides = array<i32>} : memref<104x512xf32, #tpu.memory_space<vmem>>, vector<8x512xf32>,
    %c0_22 = arith.constant 0 : index
    %c64 = arith.constant 64 : index
    %18 = vector.load %arg7[%c0_22, %c64] : memref<8x640xf32, #tpu.memory_space<vmem>>, vector<8x512xf32>
    %c48_23 = arith.constant 48 : index
    %c0_24 = arith.constant 0 : index
    %19 = vector.load %arg8[%c48_23, %c0_24] : memref<104x512xf32, #tpu.memory_space<vmem>>, vector<8x512xf32>
    tpu.vector_store %arg8[%c48_23, %c0_24], %18 {strides = array<i32>} : memref<104x512xf32, #tpu.memory_space<vmem>>, vector<8x512xf32>,
    %c0_25 = arith.constant 0 : index
    %c65 = arith.constant 65 : index
    %20 = vector.load %arg7[%c0_25, %c65] : memref<8x640xf32, #tpu.memory_space<vmem>>, vector<8x512xf32>
    %c56_26 = arith.constant 56 : index
    %c0_27 = arith.constant 0 : index
    %21 = vector.load %arg8[%c56_26, %c0_27] : memref<104x512xf32, #tpu.memory_space<vmem>>, vector<8x512xf32>
    tpu.vector_store %arg8[%c56_26, %c0_27], %20 {strides = array<i32>} : memref<104x512xf32, #tpu.memory_space<vmem>>, vector<8x512xf32>,
    %c0_28 = arith.constant 0 : index
    %c66 = arith.constant 66 : index
    %22 = vector.load %arg7[%c0_28, %c66] : memref<8x640xf32, #tpu.memory_space<vmem>>, vector<8x512xf32>
    %c64_29 = arith.constant 64 : index
    %c0_30 = arith.constant 0 : index
    %23 = vector.load %arg8[%c64_29, %c0_30] : memref<104x512xf32, #tpu.memory_space<vmem>>, vector<8x512xf32>
    tpu.vector_store %arg8[%c64_29, %c0_30], %22 {strides = array<i32>} : memref<104x512xf32, #tpu.memory_space<vmem>>, vector<8x512xf32>,
    %c0_31 = arith.constant 0 : index
    %c68 = arith.constant 68 : index
    %24 = vector.load %arg7[%c0_31, %c68] : memref<8x640xf32, #tpu.memory_space<vmem>>, vector<8x512xf32>
    %c72 = arith.constant 72 : index
    %c0_32 = arith.constant 0 : index
    %25 = vector.load %arg8[%c72, %c0_32] : memref<104x512xf32, #tpu.memory_space<vmem>>, vector<8x512xf32>
    tpu.vector_store %arg8[%c72, %c0_32], %24 {strides = array<i32>} : memref<104x512xf32, #tpu.memory_space<vmem>>, vector<8x512xf32>,
    %c0_33 = arith.constant 0 : index
    %c72_34 = arith.constant 72 : index
    %26 = vector.load %arg7[%c0_33, %c72_34] : memref<8x640xf32, #tpu.memory_space<vmem>>, vector<8x512xf32>
    %c80 = arith.constant 80 : index
    %c0_35 = arith.constant 0 : index
    %27 = vector.load %arg8[%c80, %c0_35] : memref<104x512xf32, #tpu.memory_space<vmem>>, vector<8x512xf32>
    tpu.vector_store %arg8[%c80, %c0_35], %26 {strides = array<i32>} : memref<104x512xf32, #tpu.memory_space<vmem>>, vector<8x512xf32>,
    %c0_36 = arith.constant 0 : index
    %c80_37 = arith.constant 80 : index
    %28 = vector.load %arg7[%c0_36, %c80_37] : memref<8x640xf32, #tpu.memory_space<vmem>>, vector<8x512xf32>
    %c88 = arith.constant 88 : index
    %c0_38 = arith.constant 0 : index
    %29 = vector.load %arg8[%c88, %c0_38] : memref<104x512xf32, #tpu.memory_space<vmem>>, vector<8x512xf32>
    tpu.vector_store %arg8[%c88, %c0_38], %28 {strides = array<i32>} : memref<104x512xf32, #tpu.memory_space<vmem>>, vector<8x512xf32>,
    %c0_39 = arith.constant 0 : index
    %c96 = arith.constant 96 : index
    %30 = vector.load %arg7[%c0_39, %c96] : memref<8x640xf32, #tpu.memory_space<vmem>>, vector<8x512xf32>
    %c96_40 = arith.constant 96 : index
    %c0_41 = arith.constant 0 : index
    %31 = vector.load %arg8[%c96_40, %c0_41] : memref<104x512xf32, #tpu.memory_space<vmem>>, vector<8x512xf32>
    tpu.vector_store %arg8[%c96_40, %c0_41], %30 {strides = array<i32>} : memref<104x512xf32, #tpu.memory_space<vmem>>, vector<8x512xf32>,
    %c0_42 = arith.constant 0 : index
    %c0_43 = arith.constant 0 : index
    %32 = vector.load %arg4[%c0_42, %c0_43] : memref<16x104xf32, #tpu.memory_space<vmem>>, vector<16x104xf32>
    %c0_44 = arith.constant 0 : index
    %c0_45 = arith.constant 0 : index
    %33 = vector.load %arg8[%c0_44, %c0_45] : memref<104x512xf32, #tpu.memory_space<vmem>>, vector<104x512xf32>
    %cst = arith.constant dense<0.000000e+00> : vector<16x512xf32>
    %34 = tpu.matmul %32, %33, %cst {dimension_numbers = #tpu.dot_dimension_numbers<[1], [0], [0], [1], [0, 0, 1, 1], [], []>, precision = #tpu.contract_precision<fp32>} : vector<16x104xf32>, vector<104x512xf32>, vector<16x512xf32> -> vector<16x512xf32>
    %c0_46 = arith.constant 0 : index
    %c0_47 = arith.constant 0 : index
    %35 = vector.load %arg5[%c0_46, %c0_47] : memref<16x1xf32, #tpu.memory_space<vmem>>, vector<16x1xf32>
    %36 = vector.broadcast %35 : vector<16x1xf32> to vector<16x512xf32>
    %37 = arith.addf %34, %36 : vector<16x512xf32>
    %cst_48 = arith.constant 0.000000e+00 : f32
    %38 = vector.broadcast %cst_48 : f32 to vector<16x512xf32>
    %39 = arith.maximumf %37, %38 : vector<16x512xf32>
    %c0_49 = arith.constant 0 : index
    %c0_50 = arith.constant 0 : index
    %c0_51 = arith.constant 0 : index
    %40 = vector.load %arg6[%c0_49, %c0_50, %c0_51] : memref<1x16x512xf32, #tpu.memory_space<vmem>>, vector<1x16x512xf32>
    %41 = vector.shape_cast %40 : vector<1x16x512xf32> to vector<16x512xf32>
    %42 = vector.shape_cast %39 : vector<16x512xf32> to vector<1x16x512xf32>
    tpu.vector_store %arg6[%c0_49, %c0_50, %c0_51], %42 {strides = array<i32>} : memref<1x16x512xf32, #tpu.memory_space<vmem>>, vector<1x16x512xf32>,
    return
  }
  func.func @transform_0(%arg0: i32, %arg1: i32) -> (i32, i32, i32) {
    %c0_i32 = arith.constant 0 : i32
    %c0_i32_0 = arith.constant 0 : i32
    return %arg0, %c0_i32, %arg1 : i32, i32, i32
  }
  func.func @transform_1(%arg0: i32, %arg1: i32) -> (i32, i32, i32) {
    %c1_i32 = arith.constant 1 : i32
    %0 = arith.addi %arg1, %c1_i32 : i32
    %c4_i32 = arith.constant 4 : i32
    %1 = arith.muli %0, %c4_i32 : i32
    %c0_i32 = arith.constant 0 : i32
    %c0_i32_0 = arith.constant 0 : i32
    return %arg0, %c0_i32, %1 : i32, i32, i32
  }
  func.func @transform_2(%arg0: i32, %arg1: i32) -> (i32, i32) {
    %c0_i32 = arith.constant 0 : i32
    %c0_i32_0 = arith.constant 0 : i32
    %c0_i32_1 = arith.constant 0 : i32
    return %c0_i32, %c0_i32_0 : i32, i32
  }
  func.func @transform_3(%arg0: i32, %arg1: i32) -> (i32, i32) {
    %c0_i32 = arith.constant 0 : i32
    %c0_i32_0 = arith.constant 0 : i32
    %c0_i32_1 = arith.constant 0 : i32
    return %c0_i32, %c0_i32_0 : i32, i32
  }
  func.func @transform_4(%arg0: i32, %arg1: i32) -> (i32, i32, i32) {
    %c0_i32 = arith.constant 0 : i32
    %c0_i32_0 = arith.constant 0 : i32
    return %arg0, %c0_i32, %arg1 : i32, i32, i32
  }
}

</mosaic_0001>

<bundles_post_ra>
// kernel: tpu_custom_call.1
= control target key start
LH: loop header
LB: loop body
LE: loop exit
PB: predicated region body
PF: predicated region fallthrough
CT: control target
= control target key end

     0   :  { %s4143_s0 = inlined_call_operand.hbm [shape: f32[2,8,1152], index: 0, kind: input, shape index: {}]   ;;  %s4144_s1 = inlined_call_operand.hbm [shape: f32[2,8,1152], index: 1, kind: input, shape index: {}]   ;;  %s4145_s2 = inlined_call_operand.vmem [shape: f32[16,104], index: 2, kind: input, shape index: {}]   ;;  %s4146_s3 = inlined_call_operand.vmem [shape: f32[16,1], index: 3, kind: input, shape index: {}]   ;;  %s4147_s4 = inlined_call_operand.hbm [shape: f32[2,16,1024], index: 4, kind: output, shape index: {}]  }
   0x1   :  { %4196 = sst [smem:[#allocation32_spill]] %s4147_s4 }
   0x2   :  { %9 = vsyncpa [#allocation5], 0 }
   0x3   :  { %11 = vsyncpa [#allocation5 + $0x1], 0 }
   0x4   :  { %12 = vsyncpa [#allocation8], 0 }
   0x5   :  { %14 = vsyncpa [#allocation8 + $0x1], 0 }
   0x6   :  { %15 = vsyncpa [#allocation6], 0 }
   0x7   :  { %17 = vsyncpa [#allocation6 + $0x1], 0  ;;  %s2679_s15 = smov 0   ;;  %s2681_s16 = smov 0  }
   0x8   :  { %s2683_s17 = smov 0   ;;  %s2685_s18 = smov 0  }
   0x9   :  { %s2687_s19 = smov 0   ;;  %s2689_s20 = smov 0  }
   0xa   :  { %s2691_s21 = smov 0   ;;  %s2693_s22 = smov 0  }
   0xb   :  { %s2695_s23 = smov 0   ;;  %s2697_s24 = smov 0  }
   0xc   :  { %s2699_s25 = smov 0  }
   0xd LB: > { %4197 = sst [smem:[#allocation13_spill]] %s2607_s18  ;;  %s4148_s26 = sadd.s32 4294967295, %s2635_s25   ;;  %s2635_s25 = sphi %s2699_s25, %s23_s25   ;;  %s2631_s24 = sphi %s2697_s24, %s4308_s24   ;;  %s2627_s23 = sphi %s2695_s23, %s4300_s23   ;;  %s2623_s22 = sphi %s2693_s22, %s4307_s22   ;;  %s2619_s21 = sphi %s2691_s21, %s4299_s21   ;;  %s2615_s20 = sphi %s2689_s20, %s4298_s20   ;;  %s2611_s19 = sphi %s2687_s19, %s4306_s19   ;;  %s2607_s18 = sphi %s2685_s18, %s4305_s18   ;;  %s2603_s17 = sphi %s2683_s17, %s4304_s17   ;;  %s2599_s16 = sphi %s2681_s16, %s4303_s16   ;;  %s2595_s15 = sphi %s2679_s15, %s4302_s15  }
   0xe   : > { %4198 = sst [smem:[#allocation14_spill]] %s2615_s20  ;;  %s32_s28 = sadd.s32 1, %s2627_s23 }
   0xf   : > { %4199 = sst [smem:[#allocation15_spill]] %s2623_s22  ;;  %s35_s29 = sadd.s32 1, %s2631_s24 }
  0x10   : > { %4200 = sst [smem:[#allocation16_spill]] %s2627_s23  ;;  %p33_p0 = scmp.ge.s32.totalorder %s32_s28, 2 }
  0x11   : > { %s44_s30 = sadd.s32 1, %s2615_s20  ;;  %p51_p1 = scmp.ne.s32.totalorder %s2615_s20, %s2611_s19 }
  0x12   : > { %p52_p2 = scmp.eq.s32.totalorder %s2635_s25, 0  ;;  %s4310_s28 = smov (%p33_p0, %s32_s28), 0 }
  0x13   : > { %4201 = sst [smem:[#allocation17_spill]] %s4310_s28  ;;  %s4312_s29 = smov (!%p33_p0, %s35_s29), %s2631_s24 }
  0x14   : > { %s40_s5 = ssub.s32 %s2627_s23, %s4310_s28  ;;  %p2752_p3 = por %p52_p2, %p51_p1 }
  0x15   : > { %p37_p4 = scmp.ge.s32.totalorder %s4312_s29, 2  ;;  %p57_p5 = scmp.ne.s32.totalorder %s2611_s19, %s2607_s18 }
  0x16   : > { %p2760_p6 = scmp.eq.s32.totalorder %s4148_s26, 0  ;;  %s2765_s8 = sshll.u32 %s2627_s23, 2 }
  0x17   : > { %s4314_s29 = smov (%p37_p4, %s4312_s29), 0  ;;  %s2320_s10 = sadd.s32 4, %s2765_s8 }
  0x18   : > { %4204 = sst [smem:[#allocation18_spill]] %s4314_s29  ;;  %p2774_p7 = por %p2760_p6, %p57_p5 }
  0x19   : > { %s39_s11 = ssub.s32 %s2631_s24, %s4314_s29  ;;  %s2321_s12 = sshll.u32 %s4310_s28, 2 }
  0x1a   : > { %s41_s13 = sor.u32 %s40_s5, %s39_s11  ;;  %s2322_s14 = sadd.s32 4, %s2321_s12 }
  0x1b   : > { %p42_p8 = scmp.eq.s32.totalorder %s41_s13, 0  ;;  %s72_s27 = ssub.s32 %s2320_s10, %s2322_s14 }
  0x1c   : > { %s73_s26 = sor.u32 %s72_s27, %s39_s11  ;;  %s76_s23 = sadd.s32 1, %s2603_s17 }
  0x1d   : > { %s2784_s4 = scalar_select %p42_p8, %s2615_s20, %s44_s30  }
  0x1e   : > { %p74_p9 = scmp.eq.s32.totalorder %s73_s26, 0  ;;  %p83_p10 = scmp.ne.s32.totalorder %s2603_s17, %s2599_s16 }
  0x1f   : > { %4206 = sst [smem:[#allocation19_spill]] %s2784_s4  ;;  %p89_p11 = scmp.ne.s32.totalorder %s2599_s16, %s2595_s15 }
  0x20   : > { %s4207_s22 = sadd.s32 4294967295, %s2635_s25   ;;  %p2797_p13 = por %p83_p10, %p52_p2 }
  0x21   : > { %p157_p12 = scmp.eq.s32.totalorder %s4207_s22, 3  ;;  %p2803_p0 = por %p89_p11, %p2760_p6 }
  0x22   : > { %s2793_s29 = scalar_select %p74_p9, %s2603_s17, %s76_s23  }
  0x23   : > { %p2810_p4 = por %p157_p12, %p51_p1  ;;  %s4212_s15 = sadd.s32 4294967294, %s2635_s25  }
  0x24   : > { %4208 = sst [smem:[#allocation20_spill]] %s2793_s29  ;;  %p163_p8 = scmp.eq.s32.totalorder %s4212_s15, 3 }
  0x25   : > { %p2298_p2 = scmp.ge.s32.totalorder %s2635_s25, 4 }
  0x26   : > { %p2819_p9 = por %p163_p8, %p57_p5 }
  0x27   : > { %185 = sbr.rel (%p2298_p2) target bundleno = 75 (0x4b), region = 24 }
  0x28   : > { %s4213_s22 = scalar_select %p2819_p9, 1, 0 }
  0x2a   : > { %4214 = sst [smem:[#allocation21_spill]] %s4213_s22 }
  0x2c   : > { %188 = sbr.rel (!%p2752_p3) target bundleno = 67 (0x43), region = 28  ;;  %s189_s23 = sand.u32 (%p2752_p3), 1, %s2615_s20  }
  0x2d   : > { %s2299_s26 = sshll.u32 (%p2752_p3), %s189_s23, 5  ;;  %s190_s30 = scalar_lea.sflag (%p2752_p3), [#allocation5], %s189_s23 }
  0x2e   : > { %s193_s7 = scalar_lea.vmem (%p2752_p3), [#allocation4], %s2299_s26  ;;  %s2323_s10 = smul.u32 (%p2752_p3), 9, %s2631_s24 }
  0x2f   : > { %s211_s11 = sshll.u32 (%p2752_p3), %s193_s7, 4  ;;  %s2451_s23 = scalar_lea.hbm (%p2752_p3), %s4143_s0, 144  ;;  %s212_s11 = int_to_ptr.vmem [resolvable:$true] %s211_s11 }
  0x30   : > { %s204_s12 = sadd.s32 (%p2752_p3), %s2323_s10, %s2765_s8 }
  0x31   : > { %s2303_s13 = sshll.u32 %s204_s12, 3 }
  0x32   : > { %s206_s4 = scalar_lea.hbm %s4143_s0, %s2303_s13 }
  0x33   : > { %s209_s29 = sshll.u32 %s206_s4, 4  ;;  %s210_s29 = int_to_ptr.hbm [resolvable:$true] %s209_s29 }
  0x34   : > { %s2440_s6 = sshra.s32 %s210_s29, 4  ;;  %s2441_s6 = int_to_ptr.hbm [resolvable:$true] %s2440_s6 }
  0x35   : > { %s2447_s22 = scalar_lea.hbm %s2441_s6, 32 }
  0x36   : > { %p2448_p1 = scmp.ne.s32.totalorder %s2441_s6, %s2447_s22  ;;  %p2453_p3 = scmp.lt.s32.totalorder %s2451_s23, %s2447_s22 }
  0x38   : > { %p2455_p5 = pnand %p2453_p3, %p2448_p1 }
  0x3a   : > { %2458 = shalt.err (!%p2455_p5)
}
  0x3b   : > { %s2459_s26 = sshra.s32 %s212_s11, 4  ;;  %s2637_s10 = smov [#allocation4]   ;;  %s2460_s26 = int_to_ptr.vmem [resolvable:$true] %s2459_s26 }
  0x3c   : > { %s2466_s7 = scalar_lea.vmem %s2460_s26, 32  ;;  %s2470_s12 = scalar_lea.vmem %s2637_s10, 64 }
  0x3d   : > { %p2467_p6 = scmp.ne.s32.totalorder %s2460_s26, %s2466_s7  ;;  %p2472_p10 = scmp.lt.s32.totalorder %s2470_s12, %s2466_s7 }
  0x3f   : > { %p2474_p11 = pnand %p2472_p10, %p2467_p6 }
  0x41   : > { %2477 = shalt.err (!%p2474_p11)
}
  0x42   : > { %214 = dma.hbm_to_vmem [thread:$0]  %s210_s29, 512, %s212_s11, %s190_s30  }
  0x43 PF: > { %s218_s4 = sand.u32 1, %s2603_s17   ;;  %s2218_s18 = smul.u32 9, %s2631_s24 }
  0x44   : > { %s2306_s20 = sshll.u32 %s218_s4, 3  ;;  %s219_s29 = scalar_lea.sflag [#allocation8], %s218_s4 }
  0x45   : > { %s2219_s22 = sadd.s32 %s2765_s8, %s2218_s18  ;;  %s222_s14 = scalar_lea.vmem [#allocation7], %s2306_s20 }
  0x46   : > { %s2308_s13 = sshll.u32 %s2219_s22, 3  ;;  %s234_s15 = sshll.u32 %s222_s14, 4  ;;  %s235_s15 = int_to_ptr.vmem [resolvable:$true] %s234_s15 }
  0x47   : > { %s2221_s26 = scalar_lea.hbm %s4144_s1, %s2308_s13 }
  0x48   : > { %s2222_s7 = scalar_lea.hbm %s2221_s26, 32 }
  0x49   : > { %s232_s10 = sshll.u32 %s2222_s7, 4  ;;  %s233_s10 = int_to_ptr.hbm [resolvable:$true] %s232_s10 }
  0x4a   : > { %2324 = dma.hbm_to_vmem [thread:$0]  (%p2797_p13), %s233_s10, 128, %s235_s15, %s219_s29  }
  0x4b PF: > { %p2309_p12 = scmp.ge.s32.totalorder %s2635_s25, 1  ;;  %p239_p8 = scmp.lt.s32.totalorder %s2635_s25, 5 }
  0x4d   : > { %p240_p2 = pnand %p2309_p12, %p239_p8 }
  0x4f   : > { %243 = sbr.rel (%p240_p2) target bundleno = 598 (0x256), region = 36 }
  0x54   : > { %s2846_s8 = sand.u32 1, %s2611_s19  }
  0x55   : > { %s2310_s30 = sshll.u32 %s2846_s8, 5  ;;  %s246_s11 = scalar_lea.sflag [#allocation5], %s2846_s8 }
  0x56   : > { %s2850_s12 = scalar_lea.vmem [#allocation4], %s2310_s30 }
  0x57   : > { %2580 = dma.done.wait (%p2774_p7), %s246_s11, 512  }
  0x58   : > { %2582 = vsyncadd (%p2774_p7), %s246_s11, 4294966784  ;;  %s255_s28 = sand.u32 1, %s2599_s16  }
  0x59   : > { %s2857_s4 = sshll.u32 %s255_s28, 3  ;;  %s256_s18 = scalar_lea.sflag [#allocation8], %s255_s28 }
  0x5a   : > { %s259_s20 = scalar_lea.vmem [#allocation7], %s2857_s4 }
  0x5b   : > { %2584 = dma.done.wait (%p2803_p0), %s256_s18, 128  }
  0x5c   : > { %2586 = vsyncadd (%p2803_p0), %s256_s18, 4294967168  ;;  %v298_v0 = vld [vmem:[%s2850_s12] sm:$0xff]  ;;  %s2638_s22 = smov 56   ;;  %s2639_s9 = smov 48   ;;  %v299_v1 = vld [vmem:[%s2850_s12 + $0x8] sm:$0xff]  ;;  %vm658_vm0 = vcmask 457728  }
  0x5d   : > { %648 = vrot.lane.b32.xlu2 %v298_v0, %s2638_s22  ;;  %681 = vrot.lane.b32.xlu1 %v298_v0, %s2639_s9  ;;  %s2640_s13 = smov 32   ;;  %s2641_s5 = smov 62   ;;  %v300_v2 = vld [vmem:[%s2850_s12 + $0x10] sm:$0xff]  ;;  %v2909_v5 = vld [vmem:[%s2850_s12 + $0x18] sm:$0xff]  ;;  %vm691_vm1 = vcmask 392192   ;;  %vm724_vm2 = vcmask 261120  }
  0x5e   : > { %714 = vrot.lane.b32.xlu0 %v298_v0, %s2640_s13  ;;  %s2642_s14 = smov 60   ;;  %s2643_s15 = smov 63   ;;  %v2929_v10 = vld [vmem:[%s259_s20] sm:$0xff]  ;;  %vm625_vm3 = vcmask 490496   ;;  %vm559_vm4 = vcmask 515072   ;;  %vm592_vm5 = vcmask 506880  }
  0x5f   : > { %s2644_s6 = smov 65   ;;  %s2645_s23 = smov 64   ;;  %vm526_vm6 = vcmask 523264   ;;  %vm493_vm7 = vcmask 531456   ;;  %vm460_vm8 = vcmask 539648   ;;  %vm427_vm9 = vcmask 556032  }
  0x60   : > { %s2646_s26 = smov 66   ;;  %s2647_s7 = smov 68   ;;  %vm394_vm10 = vcmask 588800   ;;  %vm803_vm11 = vcmask 850944   ;;  %vm361_vm12 = vcmask 654336   ;;  %vm328_vm13 = vcmask 785408  }
  0x61   : > { %s2648_s10 = smov 72   ;;  %s2649_s29 = smov 80  }
  0x62   : > { %s2650_s30 = smov 96   ;;  %s2159_s28 = scalar_lea.sflag [#allocation6], %s2846_s8 }
  0x65   : > { %650 = vrot.lane.b32.xlu2 %v299_v1, %s2638_s22  ;;  %683 = vrot.lane.b32.xlu1 %v299_v1, %s2639_s9 }
  0x66   : > { %716 = vrot.lane.b32.xlu0 %v299_v1, %s2640_s13 }
  0x6d   : > { %582 = vrot.lane.b32.xlu2 %v298_v0, %s2641_s5  ;;  %617 = vrot.lane.b32.xlu1 %v299_v1, %s2642_s14 }
  0x6e   : > { %615 = vrot.lane.b32.xlu0 %v298_v0, %s2642_s14 }
  0x75   : > { %551 = vrot.lane.b32.xlu2 %v299_v1, %s2643_s15  ;;  %549 = vrot.lane.b32.xlu1 %v298_v0, %s2643_s15 }
  0x76   : > { %584 = vrot.lane.b32.xlu0 %v299_v1, %s2641_s5 }
  0x7d   : > { %483 = vrot.lane.b32.xlu2 %v298_v0, %s2644_s6  ;;  %518 = vrot.lane.b32.xlu1 %v299_v1, %s2645_s23 }
  0x7e   : > { %516 = vrot.lane.b32.xlu0 %v298_v0, %s2645_s23 }
  0x85   : > { %450 = vrot.lane.b32.xlu2 %v298_v0, %s2646_s26  ;;  %718 = vrot.lane.b32.xlu1 %v300_v2, %s2640_s13 }
  0x86   : > { %485 = vrot.lane.b32.xlu0 %v299_v1, %s2644_s6 }
  0x8d   : > { %417 = vrot.lane.b32.xlu2 %v298_v0, %s2647_s7  ;;  %685 = vrot.lane.b32.xlu1 %v300_v2, %s2639_s9 }
  0x8e   : > { %452 = vrot.lane.b32.xlu0 %v299_v1, %s2646_s26 }
  0x95   : > { %384 = vrot.lane.b32.xlu2 %v298_v0, %s2648_s10  ;;  %652 = vrot.lane.b32.xlu1 %v300_v2, %s2638_s22 }
  0x96   : > { %419 = vrot.lane.b32.xlu0 %v299_v1, %s2647_s7 }
  0x9d   : > { %351 = vrot.lane.b32.xlu2 %v298_v0, %s2649_s29  ;;  %619 = vrot.lane.b32.xlu1 %v300_v2, %s2642_s14 }
  0x9e   : > { %386 = vrot.lane.b32.xlu0 %v299_v1, %s2648_s10 }
  0xa5   : > { %318 = vrot.lane.b32.xlu2 %v298_v0, %s2650_s30  ;;  %586 = vrot.lane.b32.xlu1 %v300_v2, %s2641_s5 }
  0xa6   : > { %353 = vrot.lane.b32.xlu0 %v299_v1, %s2649_s29 }
  0xad   : > { %520 = vrot.lane.b32.xlu2 %v300_v2, %s2645_s23  ;;  %553 = vrot.lane.b32.xlu1 %v300_v2, %s2643_s15 }
  0xae   : > { %320 = vrot.lane.b32.xlu0 %v299_v1, %s2650_s30 }
  0xb5   : > { %421 = vrot.lane.b32.xlu2 %v300_v2, %s2647_s7  ;;  %454 = vrot.lane.b32.xlu1 %v300_v2, %s2646_s26 }
  0xb6   : > { %487 = vrot.lane.b32.xlu0 %v300_v2, %s2644_s6 }
  0xb7   : > { %v649_v3 = vpop.permute.xlu2 %648 }
  0xbd   : > { %322 = vrot.lane.b32.xlu2 %v300_v2, %s2650_s30  ;;  %355 = vrot.lane.b32.xlu1 %v300_v2, %s2649_s29 }
  0xbe   : > { %388 = vrot.lane.b32.xlu0 %v300_v2, %s2648_s10 }
  0xbf   : > { %v2906_v4 = vpop.permute.xlu2 %650 }
  0xc0   : > { %v659_v11 = vsel %vm658_vm0, %v649_v3, %v2906_v4 }
  0xc1   : > { %v2939_v12 = vand.u32 4294901760, %v659_v11 }
  0xc3   : > { %v2956_v20 = vsub.f32 %v659_v11, %v2939_v12 }
  0xc5   : > { %654 = vrot.lane.b32.xlu2 %v2909_v5, %s2638_s22  ;;  %687 = vrot.lane.b32.xlu1 %v2909_v5, %s2639_s9  ;;  %v4164_v26 = vand.u32 4294901760, %v2956_v20 }
  0xc6   : > { %720 = vrot.lane.b32.xlu0 %v2909_v5, %s2640_s13 }
  0xc7   : > { %v2917_v6 = vpop.permute.xlu2 %582  ;;  %v874_v34 = vsub.f32 %v2956_v20, %v4164_v26 }
  0xc9   : > { %v875_v39 = vand.u32 4294901760, %v874_v34 }
  0xcd   : > { %555 = vrot.lane.b32.xlu2 %v2909_v5, %s2643_s15  ;;  %588 = vrot.lane.b32.xlu1 %v2909_v5, %s2641_s5 }
  0xce   : > { %621 = vrot.lane.b32.xlu0 %v2909_v5, %s2642_s14 }
  0xcf   : > { %v2925_v7 = vpop.permute.xlu2 %551  ;;  %v682_v8 = vpop.permute.xlu1 %681 }
  0xd0   : > { %v715_v9 = vpop.permute.xlu0 %714 }
  0xd5   : > { %722 = vrot.lane.b32.xlu2 %v2929_v10, %s2640_s13  ;;  %489 = vrot.lane.b32.xlu1 %v2909_v5, %s2644_s6 }
  0xd6   : > { %522 = vrot.lane.b32.xlu0 %v2909_v5, %s2645_s23 }
  0xd7   : > { %v2941_v13 = vpop.permute.xlu1 %683  ;;  %v2947_v16 = vpop.permute.xlu2 %483 }
  0xd8   : > { %v692_v14 = vsel %vm691_vm1, %v682_v8, %v2941_v13  ;;  %v2945_v15 = vpop.permute.xlu0 %716 }
  0xd9   : > { %v2949_v17 = vand.u32 4294901760, %v692_v14  ;;  %v725_v18 = vsel %vm724_vm2, %v715_v9, %v2945_v15 }
  0xda   : > { %v2953_v19 = vand.u32 4294901760, %v725_v18 }
  0xdb   : > { %v2959_v21 = vsub.f32 %v692_v14, %v2949_v17 }
  0xdc   : > { %v2962_v22 = vsub.f32 %v725_v18, %v2953_v19  ;;  %814 = vmatpush.msra.mxu0 %v2953_v19  ;;  %1003 = vmatpush.msra.mxu3 %v2953_v19 }
  0xdd   : > { %423 = vrot.lane.b32.xlu2 %v2909_v5, %s2647_s7  ;;  %689 = vrot.lane.b32.xlu1 %v2929_v10, %s2639_s9  ;;  %v4165_v23 = vand.u32 4294901760, %v2959_v21 }
  0xde   : > { %456 = vrot.lane.b32.xlu0 %v2909_v5, %s2646_s26  ;;  %816 = vmatpush.msra.mxu0 %v2949_v17  ;;  %v4166_v24 = vand.u32 4294901760, %v2962_v22 }
  0xdf   : > { %951 = vmatpush.msra.mxu2 %v2962_v22  ;;  %1005 = vmatpush.msra.mxu3 %v2949_v17  ;;  %v2977_v25 = vpop.permute.xlu1 %617  ;;  %v868_v30 = vsub.f32 %v2959_v21, %v4165_v23  ;;  %v2993_v33 = vpop.permute.xlu2 %450 }
  0xe0   : > { %818 = vmatpush.msra.mxu0 %v2939_v12  ;;  %v616_v27 = vpop.permute.xlu0 %615  ;;  %v862_v28 = vsub.f32 %v2962_v22, %v4166_v24 }
  0xe1   : > { %954 = vmatpush.msra.mxu2 %v2959_v21  ;;  %1007 = vmatpush.msra.mxu3 %v2939_v12  ;;  %v626_v29 = vsel %vm625_vm3, %v616_v27, %v2977_v25  ;;  %v869_v36 = vand.u32 4294901760, %v868_v30 }
  0xe2   : > { %v2991_v31 = vand.u32 4294901760, %v626_v29  ;;  %v863_v32 = vand.u32 4294901760, %v862_v28 }
  0xe3   : > { %957 = vmatpush.msra.mxu2 %v2956_v20 }
  0xe4   : > { %v3000_v35 = vsub.f32 %v626_v29, %v2991_v31  ;;  %820 = vmatpush.msra.mxu0 %v2991_v31  ;;  %864 = vmatpush.msra.mxu1 %v863_v32 }
  0xe5   : > { %1009 = vmatpush.msra.mxu3 %v2991_v31  ;;  %623 = vrot.lane.b32.xlu2 %v2929_v10, %s2642_s14 }
  0xe6   : > { %390 = vrot.lane.b32.xlu1 %v2909_v5, %s2648_s10  ;;  %656 = vrot.lane.b32.xlu0 %v2929_v10, %s2638_s22  ;;  %v4163_v37 = vand.u32 4294901760, %v3000_v35 }
  0xe7   : > { %870 = vmatpush.msra.mxu1 %v869_v36  ;;  %960 = vmatpush.msra.mxu2 %v3000_v35  ;;  %v550_v38 = vpop.permute.xlu1 %549  ;;  %v3033_v49 = vpop.permute.xlu2 %417 }
  0xe8   : > { %v560_v40 = vsel %vm559_vm4, %v550_v38, %v2925_v7  ;;  %v3014_v41 = vpop.permute.xlu0 %584  ;;  %v880_v42 = vsub.f32 %v3000_v35, %v4163_v37 }
  0xe9   : > { %v3019_v43 = vand.u32 4294901760, %v560_v40  ;;  %876 = vmatpush.msra.mxu1 %v875_v39  ;;  %v593_v44 = vsel %vm592_vm5, %v2917_v6, %v3014_v41 }
  0xea   : > { %v3024_v45 = vand.u32 4294901760, %v593_v44  ;;  %v881_v46 = vand.u32 4294901760, %v880_v42 }
  0xeb   : > { %v3027_v47 = vsub.f32 %v560_v40, %v3019_v43 }
  0xec   : > { %v3030_v48 = vsub.f32 %v593_v44, %v3024_v45  ;;  %822 = vmatpush.msra.mxu0 %v3024_v45  ;;  %882 = vmatpush.msra.mxu1 %v881_v46 }
  0xed   : > { %1011 = vmatpush.msra.mxu3 %v3024_v45  ;;  %324 = vrot.lane.b32.xlu2 %v2909_v5, %s2650_s30  ;;  %v4161_v50 = vand.u32 4294901760, %v3027_v47 }
  0xee   : > { %590 = vrot.lane.b32.xlu1 %v2929_v10, %s2641_s5  ;;  %357 = vrot.lane.b32.xlu0 %v2909_v5, %s2649_s29  ;;  %v4162_v51 = vand.u32 4294901760, %v3030_v48  ;;  %s2312_s5 = sshll.u32 %s2846_s8, 6 }
  0xef   : > { %963 = vmatpush.msra.mxu2 %v3030_v48  ;;  %v3045_v52 = vpop.permute.xlu1 %518  ;;  %824 = vmatpush.msra.mxu0 %v3019_v43  ;;  %v892_v53 = vsub.f32 %v3027_v47, %v4161_v50  ;;  %v385_v62 = vpop.permute.xlu2 %384  ;;  %s4069_s14 = scalar_lea.vmem [#allocation9], %s2312_s5 }
  0xf0   : > { %v517_v54 = vpop.permute.xlu0 %516  ;;  %1013 = vmatpush.msra.mxu3 %v3019_v43  ;;  %v886_v55 = vsub.f32 %v3030_v48, %v4162_v51  ;;  %s2173_s11 = sshll.u32 %s4069_s14, 4  ;;  %s2174_s11 = int_to_ptr.vmem [resolvable:$true] %s2173_s11 }
  0xf1   : > { %v527_v56 = vsel %vm526_vm6, %v517_v54, %v3045_v52  ;;  %966 = vmatpush.msra.mxu2 %v3027_v47  ;;  %v893_v59 = vand.u32 4294901760, %v892_v53 }
  0xf2   : > { %v3058_v57 = vand.u32 4294901760, %v527_v56  ;;  %v887_v58 = vand.u32 4294901760, %v886_v55  ;;  %v737_v55 = vld [vmem:[%s4145_s2] sm:$0xff] }
  0xf4   : > { %v3061_v60 = vsub.f32 %v527_v56, %v3058_v57  ;;  %826 = vmatpush.msra.mxu0 %v3058_v57  ;;  %888 = vmatpush.msra.mxu1 %v887_v58 }
  0xf5   : > { %1015 = vmatpush.msra.mxu3 %v3058_v57  ;;  %491 = vrot.lane.b32.xlu2 %v2929_v10, %s2644_s6  ;;  %s2314_s6 = sshll.u32 %s2619_s21, 2 }
  0xf6   : > { %524 = vrot.lane.b32.xlu1 %v2929_v10, %s2645_s23  ;;  %557 = vrot.lane.b32.xlu0 %v2929_v10, %s2643_s15  ;;  %v4160_v61 = vand.u32 4294901760, %v3061_v60  ;;  %s4292_s15 = sld [smem:[#allocation15_spill]] }
  0xf7   : > { %894 = vmatpush.msra.mxu1 %v893_v59  ;;  %969 = vmatpush.msra.mxu2 %v3061_v60  ;;  %v3073_v63 = vpop.permute.xlu1 %718 }
  0xf8   : > { %v3075_v0 = vpop.permute.xlu0 %485  ;;  %v898_v1 = vsub.f32 %v3061_v60, %v4160_v61  ;;  %v726_v46 = vsel %vm724_vm2, %v2945_v15, %v3073_v63 }
  0xf9   : > { %v494_v2 = vsel %vm493_vm7, %v2947_v16, %v3075_v0  ;;  %v352_v16 = vpop.permute.xlu2 %351  ;;  %v3162_v59 = vand.u32 4294901760, %v726_v46 }
  0xfa   : > { %v3083_v3 = vand.u32 4294901760, %v494_v2  ;;  %v899_v5 = vand.u32 4294901760, %v898_v1  ;;  %v805_v1 = vsel %vm803_vm11, %v737_v55, 0 }
  0xfc   : > { %v3086_v6 = vsub.f32 %v494_v2, %v3083_v3  ;;  %828 = vmatpush.msra.mxu0 %v3083_v3  ;;  %900 = vmatpush.msra.mxu1 %v899_v5  ;;  %v3172_v5 = vand.u32 4294901760, %v805_v1  ;;  %s2315_s23 = sshll.u32 %s4292_s15, 4 }
  0xfd   : > { %1017 = vmatpush.msra.mxu3 %v3083_v3  ;;  %392 = vrot.lane.b32.xlu2 %v2929_v10, %s2648_s10 }
  0xfe   : > { %425 = vrot.lane.b32.xlu1 %v2929_v10, %s2647_s7  ;;  %458 = vrot.lane.b32.xlu0 %v2929_v10, %s2646_s26  ;;  %v4159_v8 = vand.u32 4294901760, %v3086_v6  ;;  %s2170_s26 = sadd.s32 %s2315_s23, %s2314_s6 }
  0xff   : > { %972 = vmatpush.msra.mxu2 %v3086_v6  ;;  %v3098_v9 = vpop.permute.xlu1 %685  ;;  %s2316_s7 = sshll.u32 %s2170_s26, 3 }
 0x100   : > { %v3100_v11 = vpop.permute.xlu0 %452  ;;  %v904_v14 = vsub.f32 %v3086_v6, %v4159_v8  ;;  %v693_v56 = vsel %vm691_vm1, %v2941_v13, %v3098_v9 }
 0x101   : > { %v461_v18 = vsel %vm460_vm8, %v2993_v33, %v3100_v11  ;;  %v3133_v39 = vpop.permute.xlu2 %318  ;;  %v3174_v13 = vand.u32 4294901760, %v693_v56 }
 0x102   : > { %v3108_v27 = vand.u32 4294901760, %v461_v18  ;;  %v905_v28 = vand.u32 4294901760, %v904_v14 }
 0x104   : > { %v3111_v29 = vsub.f32 %v461_v18, %v3108_v27  ;;  %830 = vmatpush.msra.mxu0 %v3108_v27  ;;  %906 = vmatpush.msra.mxu1 %v905_v28 }
 0x105   : > { %1019 = vmatpush.msra.mxu3 %v3108_v27 }
 0x106   : > { %326 = vrot.lane.b32.xlu1 %v2929_v10, %s2650_s30  ;;  %359 = vrot.lane.b32.xlu0 %v2929_v10, %s2649_s29  ;;  %v4157_v30 = vand.u32 4294901760, %v3111_v29  ;;  %s4293_s29 = sld [smem:[#allocation32_spill]] }
 0x107   : > { %975 = vmatpush.msra.mxu2 %v3111_v29  ;;  %v3121_v32 = vpop.permute.xlu1 %652 }
 0x108   : > { %4215 = vst [vmem:[#allocation22_spill] sm:$0xff] %v3121_v32  ;;  %v3123_v33 = vpop.permute.xlu0 %419  ;;  %v910_v34 = vsub.f32 %v3111_v29, %v4157_v30 }
 0x109   : > { %v428_v36 = vsel %vm427_vm9, %v3033_v49, %v3123_v33  ;;  %v3176_v14 = vpop.permute.xlu2 %520 }
 0x10a   : > { %v3131_v38 = vand.u32 4294901760, %v428_v36  ;;  %v911_v10 = vand.u32 4294901760, %v910_v34  ;;  %4217 = vst [vmem:[#allocation24_spill] sm:$0xff] %v3176_v14 }
 0x10c   : > { %v3136_v40 = vsub.f32 %v428_v36, %v3131_v38  ;;  %832 = vmatpush.msra.mxu0 %v3131_v38  ;;  %912 = vmatpush.msra.mxu1 %v911_v10  ;;  %s2172_s30 = scalar_lea.hbm %s4293_s29, %s2316_s7  ;;  %s2527_s9 = scalar_lea.hbm %s4293_s29, 256 }
 0x10d   : > { %1021 = vmatpush.msra.mxu3 %v3131_v38  ;;  %s2175_s12 = sshll.u32 %s2172_s30, 4  ;;  %s2176_s12 = int_to_ptr.hbm [resolvable:$true] %s2175_s12 }
 0x10e   : > { %978 = vmatpush.msra.mxu2 %v3136_v40  ;;  %v4156_v42 = vand.u32 4294901760, %v3136_v40  ;;  %s2521_s4 = sshra.s32 %s2176_s12, 4  ;;  %s2522_s4 = int_to_ptr.hbm [resolvable:$true] %s2521_s4 }
 0x10f   : > { %v3142_v44 = vpop.permute.xlu1 %619  ;;  %s2523_s18 = scalar_lea.hbm %s2522_s4, 64  ;;  %p2528_p1 = scmp.lt.s32.totalorder %s2522_s4, %s4293_s29 }
 0x110   : > { %4216 = vst [vmem:[#allocation23_spill] sm:$0xff] %v3142_v44  ;;  %v3147_v49 = vpop.permute.xlu0 %386  ;;  %v916_v53 = vsub.f32 %v3136_v40, %v4156_v42  ;;  %v627_v34 = vsel %vm625_vm3, %v2977_v25, %v3142_v44  ;;  %p2524_p7 = scmp.ne.s32.totalorder %s2522_s4, %s2523_s18  ;;  %p2529_p3 = scmp.lt.s32.totalorder %s2527_s9, %s2523_s18 }
 0x111   : > { %v395_v54 = vsel %vm394_vm10, %v385_v62, %v3147_v49  ;;  %v660_v62 = vsel %vm658_vm0, %v2906_v4, %v3121_v32  ;;  %v3182_v4 = vsub.f32 %v726_v46, %v3162_v59  ;;  %v3200_v46 = vsub.f32 %v693_v56, %v3174_v13  ;;  %v3236_v61 = vpop.permute.xlu2 %421 }
 0x112   : > { %v3160_v58 = vand.u32 4294901760, %v395_v54  ;;  %v917_v15 = vand.u32 4294901760, %v916_v53  ;;  %v3184_v28 = vand.u32 4294901760, %v660_v62  ;;  %v528_v56 = vsel %vm526_vm6, %v3045_v52, %v3176_v14  ;;  %4220 = vst [vmem:[#allocation27_spill] sm:$0xff] %v3236_v61  ;;  %p2525_p13 = pnand %p2524_p7, %p2810_p4  ;;  %p2530_p5 = por %p2529_p3, %p2528_p1 }
 0x114   : > { %v3169_v2 = vsub.f32 %v395_v54, %v3160_v58  ;;  %834 = vmatpush.msra.mxu0 %v3160_v58  ;;  %918 = vmatpush.msra.mxu1 %v917_v15  ;;  %v3197_v54 = vsub.f32 %v805_v1, %v3172_v5  ;;  %v3207_v15 = vand.u32 4294901760, %v627_v34  ;;  %v4167_v1 = vand.u32 4294901760, %v3182_v4  ;;  %p2526_p0 = pneg %p2525_p13 }
 0x115   : > { %1023 = vmatpush.msra.mxu3 %v3160_v58 }
 0x116   : > { %981 = vmatpush.msra.mxu2 %v3169_v2  ;;  %v4158_v18 = vand.u32 4294901760, %v3169_v2  ;;  %v1195_v50 = vsub.f32 %v3182_v4, %v4167_v1  ;;  %p2531_p6 = pnand %p2530_p5, %p2526_p0 }
 0x117   : > { %v3189_v36 = vpop.permute.xlu1 %586 }
 0x118   : > { %4218 = vst [vmem:[#allocation25_spill] sm:$0xff] %v3189_v36  ;;  %v3191_v10 = vpop.permute.xlu0 %353  ;;  %v922_v53 = vsub.f32 %v3169_v2, %v4158_v18  ;;  %v594_v55 = vsel %vm592_vm5, %v3014_v41, %v3189_v36  ;;  %v3212_v18 = vsub.f32 %v660_v62, %v3184_v28 }
 0x119   : > { %v362_v25 = vsel %vm361_vm12, %v352_v16, %v3191_v10  ;;  %v3218_v8 = vand.u32 4294901760, %v594_v55  ;;  %v3225_v16 = vand.u32 4294901760, %v3197_v54 }
 0x11a   : > { %v3209_v42 = vand.u32 4294901760, %v362_v25  ;;  %v923_v30 = vand.u32 4294901760, %v922_v53  ;;  %v3230_v53 = vsub.f32 %v627_v34, %v3207_v15 }
 0x11b   : > { %4219 = vst [vmem:[#allocation26_spill] sm:$0xff] %v3225_v16  ;;  %v3245_v34 = vsub.f32 %v594_v55, %v3218_v8  ;;  %v842_v24 = vsub.f32 %v3197_v54, %v3225_v16  ;;  %v4222_v55 = vand.u32 4294901760, %v3200_v46 }
 0x11c   : > { %v3221_v41 = vsub.f32 %v362_v25, %v3209_v42  ;;  %836 = vmatpush.msra.mxu0 %v3209_v42  ;;  %924 = vmatpush.msra.mxu1 %v923_v30  ;;  %v3234_v25 = vand.u32 4294901760, %v528_v56 }
 0x11d   : > { %1025 = vmatpush.msra.mxu3 %v3209_v42  ;;  %v1201_v51 = vsub.f32 %v3200_v46, %v4222_v55 }
 0x11e   : > { %984 = vmatpush.msra.mxu2 %v3221_v41  ;;  %v4170_v52 = vand.u32 4294901760, %v3221_v41  ;;  %v3269_v36 = vsub.f32 %v528_v56, %v3234_v25 }
 0x11f   : > { %v3238_v30 = vpop.permute.xlu1 %553 }
 0x120   : > { %4221 = vst [vmem:[#allocation28_spill] sm:$0xff] %v3238_v30  ;;  %v561_v37 = vsel %vm559_vm4, %v2925_v7, %v3238_v30  ;;  %v321_v26 = vpop.permute.xlu0 %320  ;;  %v928_v23 = vsub.f32 %v3221_v41, %v4170_v52  ;;  %v429_v7 = vsel %vm427_vm9, %v3123_v33, %v3236_v61  ;;  %v4223_v33 = vand.u32 4294901760, %v3212_v18 }
 0x121   : > { %v3255_v62 = vand.u32 4294901760, %v561_v37  ;;  %v329_v1 = vsel %vm328_vm13, %v3133_v39, %v321_v26  ;;  %v1196_v39 = vand.u32 4294901760, %v1195_v50  ;;  %v3282_v52 = vand.u32 4294901760, %v842_v24 }
 0x122   : > { %v3265_v14 = vand.u32 4294901760, %v329_v1  ;;  %v929_v30 = vand.u32 4294901760, %v928_v23  ;;  %v1207_v55 = vsub.f32 %v3212_v18, %v4223_v33  ;;  %v3284_v56 = vand.u32 4294901760, %v429_v7 }
 0x123   : > { %v3272_v44 = vsub.f32 %v561_v37, %v3255_v62  ;;  %4224 = vst [vmem:[#allocation29_spill] sm:$0xff] %v3282_v52  ;;  %v4225_v37 = vand.u32 4294901760, %v2962_v22  ;;  %v1202_v50 = vand.u32 4294901760, %v1201_v51  ;;  %v4227_v23 = vand.u32 4294901760, %v2959_v21 }
 0x124   : > { %v3275_v32 = vsub.f32 %v329_v1, %v3265_v14  ;;  %838 = vmatpush.msra.mxu0 %v3265_v14  ;;  %930 = vmatpush.msra.mxu1 %v929_v30  ;;  %v4226_v1 = vand.u32 4294901760, %v3230_v53  ;;  %v4229_v21 = vand.u32 4294901760, %v3245_v34  ;;  %v3314_v22 = vsub.f32 %v429_v7, %v3284_v56 }
 0x125   : > { %1027 = vmatpush.msra.mxu3 %v3265_v14  ;;  %844 = vmatmul.f32.vlgmr.msra.gmra.mxu0 %v3282_v52  ;;  %v4232_v7 = vand.u32 4294901760, %v3272_v44 }
 0x126   : > { %1047 = vmatpush.msrb.mxu0 %v4225_v37  ;;  %987 = vmatpush.msra.mxu2 %v3275_v32  ;;  %v1213_v30 = vsub.f32 %v3230_v53, %v4226_v1  ;;  %v4175_v33 = vand.u32 4294901760, %v3275_v32  ;;  %v1208_v37 = vand.u32 4294901760, %v1207_v55  ;;  %v4230_v55 = vand.u32 4294901760, %v2956_v20 }
 0x127   : > { %1197 = vmatpush.msrb.mxu3 %v1196_v39  ;;  %v3298_v61 = vpop.permute.xlu1 %454  ;;  %v1225_v52 = vsub.f32 %v3272_v44, %v4232_v7  ;;  %990 = vmatmul.f32.vlgmr.msra.gmra.mxu2 %v3197_v54  ;;  %v4235_v7 = vand.u32 4294901760, %v3030_v48 }
 0x128   : > { %1051 = vmatpush.msrb.mxu0 %v4227_v23  ;;  %1147 = vmatpush.msrb.mxu2 %v3162_v59  ;;  %4228 = vst [vmem:[#allocation30_spill] sm:$0xff] %v3298_v61  ;;  %v462_v51 = vsel %vm460_vm8, %v3100_v11, %v3298_v61  ;;  %v3304_v39 = vpop.permute.xlu0 %487  ;;  %v934_v1 = vsub.f32 %v3275_v32, %v4175_v33  ;;  %v3324_v33 = vpop.permute.xlu2 %322 }
 0x129   : > { %1203 = vmatpush.msrb.mxu3 %v1202_v50  ;;  %v1219_v23 = vsub.f32 %v3245_v34, %v4229_v21  ;;  %v3316_v50 = vand.u32 4294901760, %v462_v51  ;;  %v495_v11 = vsel %vm493_vm7, %v3075_v0, %v3304_v39  ;;  %4231 = vst [vmem:[#allocation31_spill] sm:$0xff] %v3324_v33  ;;  %v1214_v21 = vand.u32 4294901760, %v1213_v30  ;;  %v738_v30 = vld [vmem:[%s4145_s2 + $0x8] sm:$0xff] }
 0x12a   : > { %1055 = vmatpush.msrb.mxu0 %v4230_v55  ;;  %1149 = vmatpush.msrb.mxu2 %v3174_v13  ;;  %v3326_v24 = vand.u32 4294901760, %v495_v11  ;;  %v935_v61 = vand.u32 4294901760, %v934_v1  ;;  %v330_v0 = vsel %vm328_vm13, %v321_v26, %v3324_v33  ;;  %v4233_v55 = vand.u32 4294901760, %v3000_v35 }
 0x12b   : > { %1209 = vmatpush.msrb.mxu3 %v1208_v37  ;;  %v3335_v20 = vsub.f32 %v462_v51, %v3316_v50  ;;  %v1220_v1 = vand.u32 4294901760, %v1219_v23  ;;  %v4234_v26 = vand.u32 4294901760, %v3269_v36  ;;  %v3354_v33 = vand.u32 4294901760, %v330_v0 }
 0x12c   : > { %1059 = vmatpush.msrb.mxu0 %v4233_v55  ;;  %1151 = vmatpush.msrb.mxu2 %v3184_v28  ;;  %v3344_v37 = vsub.f32 %v495_v11, %v3326_v24  ;;  %v1248_v55 = vand.u32 4294901760, %v3314_v22  ;;  %v808_v11 = vsel %vm803_vm11, %v738_v30, 0 }
 0x12d   : > { %1215 = vmatpush.msrb.mxu3 %v1214_v21  ;;  %936 = vmatpush.msra.mxu1 %v935_v61  ;;  %v1231_v51 = vsub.f32 %v3269_v36, %v4234_v26  ;;  %v1242_v35 = vand.u32 4294901760, %v3335_v20  ;;  %v1226_v61 = vand.u32 4294901760, %v1225_v52  ;;  %v4236_v21 = vand.u32 4294901760, %v3027_v47 }
 0x12e   : > { %1063 = vmatpush.msrb.mxu0 %v4235_v7  ;;  %1153 = vmatpush.msrb.mxu2 %v3207_v15  ;;  %v1236_v23 = vand.u32 4294901760, %v3344_v37  ;;  %v4237_v7 = vand.u32 4294901760, %v3061_v60 }
 0x12f   : > { %1109 = vmatpush.msrb.mxu1 %v2953_v19  ;;  %1221 = vmatpush.msrb.mxu3 %v1220_v1  ;;  %v3362_v19 = vpop.permute.xlu1 %355  ;;  %v1232_v52 = vand.u32 4294901760, %v1231_v51  ;;  %v3387_v51 = vsub.f32 %v330_v0, %v3354_v33 }
 0x130   : > { %1067 = vmatpush.msrb.mxu0 %v4236_v21  ;;  %1155 = vmatpush.msrb.mxu2 %v3218_v8  ;;  %v363_v48 = vsel %vm361_vm12, %v3191_v10, %v3362_v19  ;;  %v3368_v1 = vpop.permute.xlu0 %388  ;;  %v1237_v30 = vsub.f32 %v3344_v37, %v1236_v23  ;;  %v3384_v10 = vand.u32 4294901760, %v808_v11 }
 0x131   : > { %1111 = vmatpush.msrb.mxu1 %v2949_v17  ;;  %1227 = vmatpush.msrb.mxu3 %v1226_v61  ;;  %v1243_v17 = vsub.f32 %v3335_v20, %v1242_v35  ;;  %v3376_v47 = vand.u32 4294901760, %v363_v48  ;;  %v396_v26 = vsel %vm394_vm10, %v3147_v49, %v3368_v1  ;;  %v1249_v49 = vsub.f32 %v3314_v22, %v1248_v55 }
 0x132   : > { %1071 = vmatpush.msrb.mxu0 %v4237_v7  ;;  %v3389_v61 = vand.u32 4294901760, %v396_v26  ;;  %1157 = vmatpush.msrb.mxu2 %v3255_v62  ;;  %v1238_v21 = vand.u32 4294901760, %v1237_v30  ;;  %v4239_v30 = vand.u32 4294901760, %v3111_v29  ;;  %v3410_v7 = vsub.f32 %v808_v11, %v3384_v10 }
 0x133   : > { %1113 = vmatpush.msrb.mxu1 %v2939_v12  ;;  %1233 = vmatpush.msrb.mxu3 %v1232_v52  ;;  %v3396_v60 = vsub.f32 %v363_v48, %v3376_v47  ;;  %v4238_v12 = vand.u32 4294901760, %v3086_v6  ;;  %v1244_v52 = vand.u32 4294901760, %v1243_v17  ;;  %v4240_v17 = vand.u32 4294901760, %v3136_v40 }
 0x134   : > { %v3402_v0 = vsub.f32 %v396_v26, %v3389_v61  ;;  %1159 = vmatpush.msrb.mxu2 %v3234_v25  ;;  %v1266_v26 = vand.u32 4294901760, %v3387_v51  ;;  %v4241_v40 = vand.u32 4294901760, %v3169_v2  ;;  %938 = vmatmul.f32.vlgmr.msra.gmra.mxu1 %v3172_v5  ;;  %v4243_v2 = vand.u32 4294901760, %v3275_v32 }
 0x135   : > { %1075 = vmatpush.msrb.mxu0 %v4238_v12  ;;  %1115 = vmatpush.msrb.mxu1 %v2991_v31  ;;  %v1260_v48 = vand.u32 4294901760, %v3396_v60  ;;  %v1250_v31 = vand.u32 4294901760, %v1249_v49 }
 0x136   : > { %1239 = vmatpush.msrb.mxu3 %v1238_v21  ;;  %1161 = vmatpush.msrb.mxu2 %v3326_v24  ;;  %v1254_v6 = vand.u32 4294901760, %v3402_v0  ;;  %v1267_v12 = vsub.f32 %v3387_v51, %v1266_v26 }
 0x137   : > { %1079 = vmatpush.msrb.mxu0 %v4239_v30  ;;  %1117 = vmatpush.msrb.mxu1 %v3024_v45  ;;  %v3418_v29 = vpop.permute.xlu1 %687  ;;  %v1261_v21 = vsub.f32 %v3396_v60, %v1260_v48  ;;  %v4242_v30 = vand.u32 4294901760, %v3221_v41 }
 0x138   : > { %1245 = vmatpush.msrb.mxu3 %v1244_v52  ;;  %1163 = vmatpush.msrb.mxu2 %v3316_v50  ;;  %v3421_v45 = vpop.permute.xlu0 %720  ;;  %v1255_v11 = vsub.f32 %v3402_v0, %v1254_v6  ;;  %v3440_v52 = vpop.permute.xlu2 %654 }
 0x139   : > { %1083 = vmatpush.msrb.mxu0 %v4240_v17  ;;  %1119 = vmatpush.msrb.mxu1 %v3019_v43  ;;  %v3433_v43 = vand.u32 4294901760, %v3410_v7  ;;  %v1268_v17 = vand.u32 4294901760, %v1267_v12  ;;  %v4256_v12 = vld [vmem:[#allocation24_spill] sm:$0xff] }
 0x13a   : > { %1251 = vmatpush.msrb.mxu3 %v1250_v31  ;;  %1165 = vmatpush.msrb.mxu2 %v3284_v56  ;;  %v1256_v49 = vand.u32 4294901760, %v1255_v11 }
 0x13b   : > { %1087 = vmatpush.msrb.mxu0 %v4241_v40  ;;  %1121 = vmatpush.msrb.mxu1 %v3058_v57  ;;  %v1262_v57 = vand.u32 4294901760, %v1261_v21  ;;  %v850_v31 = vsub.f32 %v3410_v7, %v3433_v43 }
 0x13c   : > { %1167 = vmatpush.msrb.mxu2 %v3389_v61  ;;  %1257 = vmatpush.msrb.mxu3 %v1256_v49 }
 0x13d   : > { %1091 = vmatpush.msrb.mxu0 %v4242_v30  ;;  %1123 = vmatpush.msrb.mxu1 %v3083_v3  ;;  %v3462_v41 = vand.u32 4294901760, %v850_v31 }
 0x13e   : > { %1169 = vmatpush.msrb.mxu2 %v3376_v47  ;;  %1263 = vmatpush.msrb.mxu3 %v1262_v57 }
 0x13f   : > { %1095 = vmatpush.msrb.mxu0 %v4243_v2  ;;  %1125 = vmatpush.msrb.mxu1 %v3108_v27  ;;  %v3455_v3 = vpop.permute.xlu1 %588  ;;  %v4244_v27 = vand.u32 4294901760, %v3182_v4 }
 0x140   : > { %1171 = vmatpush.msrb.mxu2 %v3354_v33  ;;  %1269 = vmatpush.msrb.mxu3 %v1268_v17  ;;  %v3457_v32 = vpop.permute.xlu0 %621  ;;  %v3471_v11 = vpop.permute.xlu2 %555 }
 0x141   : > { %1284 = vmatpush.msra.mxu0 %v3182_v4  ;;  %1127 = vmatpush.msrb.mxu1 %v3131_v38  ;;  %v4245_v38 = vand.u32 4294901760, %v3200_v46  ;;  %v4246_v4 = vand.u32 4294901760, %v3212_v18 }
 0x142   : > { %1380 = vmatpush.msra.mxu2 %v4244_v27  ;;  %1031 = vmatmul.f32.vlgmr.msra.gmra.mxu3 %v3225_v16 }
 0x143   : > { %1287 = vmatpush.msra.mxu0 %v3200_v46  ;;  %1129 = vmatpush.msrb.mxu1 %v3160_v58  ;;  %v4247_v58 = vand.u32 4294901760, %v3230_v53 }
 0x144   : > { %1442 = vmatpush.msra.mxu3 %v3162_v59  ;;  %1384 = vmatpush.msra.mxu2 %v4245_v38 }
 0x145   : > { %1290 = vmatpush.msra.mxu0 %v3212_v18  ;;  %1131 = vmatpush.msrb.mxu1 %v3209_v42 }
 0x146   : > { %1444 = vmatpush.msra.mxu3 %v3174_v13  ;;  %852 = vmatmul.f32.gmra.mxu0 %v3462_v41 }
 0x147   : > { %1293 = vmatpush.msra.mxu0 %v3230_v53  ;;  %1388 = vmatpush.msra.mxu2 %v4246_v4  ;;  %v3488_v46 = vpop.permute.xlu1 %489  ;;  %v4252_v53 = vld [vmem:[#allocation29_spill] sm:$0xff] }
 0x148   : > { %1133 = vmatpush.msrb.mxu1 %v3265_v14  ;;  %1446 = vmatpush.msra.mxu3 %v3184_v28  ;;  %v3482_v42 = vpop.permute.xlu0 %522  ;;  %v4248_v14 = vand.u32 4294901760, %v3245_v34  ;;  %v3501_v18 = vpop.permute.xlu2 %722  ;;  %v496_v31 = vsel %vm493_vm7, %v3304_v39, %v3488_v46  ;;  %v792_v39 = vld [vmem:[%s4146_s3 + $0x8] sm:$0xff] }
 0x149   : > { %942 = vmatmul.f32.gmra.mxu1 %v3384_v10  ;;  %1296 = vmatpush.msra.mxu0 %v3245_v34  ;;  %v529_v30 = vsel %vm526_vm6, %v4256_v12, %v3482_v42 }
 0x14a   : > { %1336 = vmatpush.msra.mxu1 %v3162_v59  ;;  %1392 = vmatpush.msra.mxu2 %v4247_v58  ;;  %v4249_v59 = vand.u32 4294901760, %v3272_v44  ;;  %v3631_v38 = vand.u32 4294901760, %v529_v30 }
 0x14b   : > { %1448 = vmatpush.msra.mxu3 %v3207_v15  ;;  %1299 = vmatpush.msra.mxu0 %v3272_v44 }
 0x14c   : > { %1338 = vmatpush.msra.mxu1 %v3174_v13  ;;  %1396 = vmatpush.msra.mxu2 %v4248_v14  ;;  %v4250_v13 = vand.u32 4294901760, %v3269_v36  ;;  %v4257_v14 = vld [vmem:[#allocation30_spill] sm:$0xff] }
 0x14d   : > { %1450 = vmatpush.msra.mxu3 %v3218_v8  ;;  %1302 = vmatpush.msra.mxu0 %v3269_v36 }
 0x14e   : > { %1340 = vmatpush.msra.mxu1 %v3184_v28  ;;  %1400 = vmatpush.msra.mxu2 %v4249_v59  ;;  %v727_v28 = vsel %vm724_vm2, %v3073_v63, %v3421_v45  ;;  %v694_v63 = vsel %vm691_vm1, %v3098_v9, %v3418_v29 }
 0x14f   : > { %995 = vmatmul.f32.gmra.mxu2 %v3410_v7  ;;  %1452 = vmatpush.msra.mxu3 %v3255_v62  ;;  %v3521_v36 = vpop.permute.xlu1 %689  ;;  %v3544_v34 = vand.u32 4294901760, %v694_v63 }
 0x150   : > { %1097 = vmatmul.f32.vlgmr.msrb.gmra.mxu0 %v3172_v5  ;;  %1342 = vmatpush.msra.mxu1 %v3207_v15  ;;  %v3510_v44 = vpop.permute.xlu0 %456  ;;  %v3530_v15 = vand.u32 4294901760, %v727_v28  ;;  %v3542_v9 = vpop.permute.xlu2 %423 }
 0x151   : > { %1305 = vmatpush.msra.mxu0 %v3344_v37  ;;  %1404 = vmatpush.msra.mxu2 %v4250_v13  ;;  %v463_v59 = vsel %vm460_vm8, %v4257_v14, %v3510_v44  ;;  %v2651_v13 = vmov 0  }
 0x152   : > { %1037 = vmatmul.f32.gmra.mxu3 %v3433_v43  ;;  %1135 = vmatmul.f32.vlgmr.msrb.gmra.mxu1 %v3172_v5 }
 0x153   : > { %1454 = vmatpush.msra.mxu3 %v3234_v25  ;;  %1308 = vmatpush.msra.mxu0 %v3335_v20 }
 0x154   : > { %1344 = vmatpush.msra.mxu1 %v3218_v8  ;;  %1408 = vmatpush.msra.mxu2 %v1236_v23  ;;  %v4251_v8 = vld [vmem:[#allocation22_spill] sm:$0xff] }
 0x155   : > { %1456 = vmatpush.msra.mxu3 %v3326_v24  ;;  %1311 = vmatpush.msra.mxu0 %v3314_v22  ;;  %v4253_v22 = vld [vmem:[#allocation23_spill] sm:$0xff] }
 0x156   : > { %1346 = vmatpush.msra.mxu1 %v3255_v62  ;;  %1412 = vmatpush.msra.mxu2 %v1242_v35  ;;  %v661_v62 = vsel %vm658_vm0, %v4251_v8, %v3440_v52  ;;  %v628_v20 = vsel %vm625_vm3, %v4253_v22, %v3457_v32  ;;  %v3651_v8 = vand.u32 4294901760, %v496_v31 }
 0x157   : > { %1458 = vmatpush.msra.mxu3 %v3316_v50  ;;  %1314 = vmatpush.msra.mxu0 %v3402_v0  ;;  %v3557_v37 = vand.u32 4294901760, %v661_v62  ;;  %v4254_v0 = vld [vmem:[#allocation25_spill] sm:$0xff] }
 0x158   : > { %1348 = vmatpush.msra.mxu1 %v3234_v25  ;;  %1416 = vmatpush.msra.mxu2 %v1248_v55  ;;  %v3549_v25 = vsub.f32 %v727_v28, %v3530_v15  ;;  %v3561_v35 = vpop.permute.xlu0 %656  ;;  %v3569_v55 = vand.u32 4294901760, %v628_v20  ;;  %v3577_v21 = vpop.permute.xlu1 %390  ;;  %v4258_v28 = vld [vmem:[#allocation27_spill] sm:$0xff] }
 0x159   : > { %1177 = vmatmul.f32.vlgmr.msrb.gmra.mxu2 %v4252_v53  ;;  %1460 = vmatpush.msra.mxu3 %v3284_v56  ;;  %v3607_v49 = vpop.permute.xlu2 %623  ;;  %v397_v12 = vsel %vm394_vm10, %v3368_v1, %v3577_v21  ;;  %v695_v1 = vsel %vm691_vm1, %v3418_v29, %v3521_v36 }
 0x15a   : > { %1317 = vmatpush.msra.mxu0 %v3396_v60  ;;  %1350 = vmatpush.msra.mxu1 %v3326_v24  ;;  %v3567_v24 = vsub.f32 %v694_v63, %v3544_v34  ;;  %v4185_v23 = vand.u32 4294901760, %v3549_v25  ;;  %v4255_v60 = vld [vmem:[#allocation28_spill] sm:$0xff]  ;;  %v430_v63 = vsel %vm427_vm9, %v4258_v28, %v3542_v9 }
 0x15b   : > { %1420 = vmatpush.msra.mxu2 %v1254_v6  ;;  %1271 = vmatmul.f32.vlgmr.msrb.gmra.mxu3 %v3172_v5  ;;  %v595_v6 = vsel %vm592_vm5, %v4254_v0, %v3455_v3 }
 0x15c   : > { %1462 = vmatpush.msra.mxu3 %v3389_v61  ;;  %1320 = vmatpush.msra.mxu0 %v3387_v51  ;;  %v3592_v40 = vand.u32 4294901760, %v595_v6  ;;  %v4183_v51 = vand.u32 4294901760, %v3567_v24 }
 0x15d   : > { %1352 = vmatpush.msra.mxu1 %v3316_v50  ;;  %1424 = vmatpush.msra.mxu2 %v1260_v48  ;;  %v3583_v50 = vsub.f32 %v661_v62, %v3557_v37  ;;  %v562_v48 = vsel %vm559_vm4, %v4255_v60, %v3471_v11  ;;  %v3665_v60 = vsub.f32 %v529_v30, %v3631_v38 }
 0x15e   : > { %1464 = vmatpush.msra.mxu3 %v3376_v47  ;;  %1480 = vmatpush.msrb.mxu0 %v3530_v15  ;;  %v3618_v2 = vsub.f32 %v595_v6, %v3592_v40  ;;  %v1534_v17 = vsub.f32 %v3567_v24, %v4183_v51  ;;  %v728_v6 = vsel %vm724_vm2, %v3421_v45, %v3501_v18 }
 0x15f   : > { %1354 = vmatpush.msra.mxu1 %v3284_v56  ;;  %1428 = vmatpush.msra.mxu2 %v1266_v26  ;;  %v3595_v56 = vsub.f32 %v628_v20, %v3569_v55  ;;  %v1528_v26 = vsub.f32 %v3549_v25, %v4185_v23  ;;  %v4182_v57 = vand.u32 4294901760, %v3583_v50  ;;  %v3679_v18 = vsub.f32 %v496_v31, %v3651_v8 }
 0x160   : > { %1466 = vmatpush.msra.mxu3 %v3354_v33  ;;  %1482 = vmatpush.msrb.mxu0 %v3544_v34  ;;  %v3654_v62 = vpop.permute.xlu1 %590  ;;  %v1535_v22 = vand.u32 4294901760, %v1534_v17  ;;  %v4180_v0 = vand.u32 4294901760, %v3618_v2  ;;  %v3683_v30 = vand.u32 4294901760, %v728_v6  ;;  %v4186_v29 = vand.u32 4294901760, %v3665_v60 }
 0x161   : > { %1617 = vmatpush.msrb.mxu2 %v3549_v25  ;;  %1356 = vmatpush.msra.mxu1 %v3389_v61  ;;  %v3605_v61 = vand.u32 4294901760, %v562_v48  ;;  %v4181_v27 = vand.u32 4294901760, %v3595_v56  ;;  %v1529_v4 = vand.u32 4294901760, %v1528_v26  ;;  %v3671_v26 = vand.u32 4294901760, %v430_v63 }
 0x162   : > { %1669 = vmatpush.msrb.mxu3 %v3530_v15  ;;  %1185 = vmatmul.f32.gmra.mxu2 %v3462_v41  ;;  %v1552_v31 = vsub.f32 %v3618_v2, %v4180_v0  ;;  %v3719_v0 = vand.u32 4294901760, %v695_v1 }
 0x163   : > { %1484 = vmatpush.msrb.mxu0 %v3557_v37  ;;  %1620 = vmatpush.msrb.mxu2 %v3567_v24  ;;  %v3639_v58 = vsub.f32 %v562_v48, %v3605_v61  ;;  %v1546_v20 = vsub.f32 %v3595_v56, %v4181_v27  ;;  %v3667_v48 = vand.u32 4294901760, %v463_v59  ;;  %4260 = vst [vmem:[#allocation29_spill] sm:$0xff] %v3671_v26 }
 0x164   : > { %1358 = vmatpush.msra.mxu1 %v3376_v47  ;;  %1671 = vmatpush.msrb.mxu3 %v3544_v34  ;;  %v3625_v47 = vpop.permute.xlu0 %357  ;;  %v3706_v36 = vsub.f32 %v430_v63, %v3671_v26  ;;  %v4187_v63 = vand.u32 4294901760, %v3679_v18  ;;  %v3724_v27 = vsub.f32 %v728_v6, %v3683_v30  ;;  %v1564_v6 = vsub.f32 %v3665_v60, %v4186_v29 }
 0x165   : > { %1101 = vmatmul.f32.gmra.mxu0 %v3384_v10  ;;  %1275 = vmatmul.f32.gmra.mxu3 %v3384_v10  ;;  %4259 = vst [vmem:[#allocation22_spill] sm:$0xff] %v3667_v48  ;;  %v4184_v45 = vand.u32 4294901760, %v3639_v58  ;;  %v3695_v14 = vsub.f32 %v463_v59, %v3667_v48  ;;  %v364_v28 = vsel %vm361_vm12, %v3362_v19, %v3625_v47  ;;  %v791_v59 = vld [vmem:[%s4146_s3] sm:$0xff] }
 0x166   : > { %1486 = vmatpush.msrb.mxu0 %v3569_v55  ;;  %1623 = vmatpush.msrb.mxu2 %v3583_v50  ;;  %v3729_v51 = vand.u32 4294901760, %v364_v28  ;;  %v1570_v29 = vsub.f32 %v3679_v18, %v4187_v63 }
 0x167   : > { %1360 = vmatpush.msra.mxu1 %v3354_v33  ;;  %1673 = vmatpush.msrb.mxu3 %v3557_v37  ;;  %v1540_v33 = vsub.f32 %v3583_v50, %v4182_v57  ;;  %v1558_v19 = vsub.f32 %v3639_v58, %v4184_v45  ;;  %v662_v57 = vsel %vm658_vm0, %v3440_v52, %v3561_v35  ;;  %v4188_v23 = vand.u32 4294901760, %v3695_v14 }
 0x168   : > { %2439 = vset.pattern.permute.xlu0 %v2651_v13  ;;  %1139 = vmatmul.f32.gmra.mxu1 %v3384_v10  ;;  %v525_v45 = vpop.permute.xlu1 %524 }
 0x169   : > { %1488 = vmatpush.msrb.mxu0 %v3592_v40  ;;  %1530 = vmatpush.msrb.mxu1 %v1529_v4  ;;  %v1541_v17 = vand.u32 4294901760, %v1540_v33  ;;  %v3685_v4 = vpop.permute.xlu2 %324  ;;  %v3697_v33 = vand.u32 4294901760, %v397_v12  ;;  %v1559_v35 = vand.u32 4294901760, %v1558_v19 }
 0x16a   : > { %1626 = vmatpush.msrb.mxu2 %v3595_v56  ;;  %800 = vperm.xlu0 %2439, %v792_v39   ;;  %v1547_v39 = vand.u32 4294901760, %v1546_v20  ;;  %v4262_v20 = vld [vmem:[#allocation31_spill] sm:$0xff] }
 0x16b   : > { %1675 = vmatpush.msrb.mxu3 %v3569_v55  ;;  %1490 = vmatpush.msrb.mxu0 %v3605_v61  ;;  %4261 = vst [vmem:[#allocation23_spill] sm:$0xff] %v3697_v33 }
 0x16c   : > { %1536 = vmatpush.msrb.mxu1 %v1535_v22  ;;  %1629 = vmatpush.msrb.mxu2 %v3618_v2  ;;  %v558_v22 = vpop.permute.xlu0 %557 }
 0x16d   : > { %1677 = vmatpush.msrb.mxu3 %v3592_v40  ;;  %1430 = vmatmul.f32.vlgmr.msra.gmra.mxu2 %v3172_v5 }
 0x16e   : > { %1492 = vmatpush.msrb.mxu0 %v3631_v38  ;;  %1542 = vmatpush.msrb.mxu1 %v1541_v17  ;;  %v331_v17 = vsel %vm328_vm13, %v4262_v20, %v3685_v4  ;;  %v3733_v20 = vsub.f32 %v397_v12, %v3697_v33  ;;  %v629_v12 = vsel %vm625_vm3, %v3457_v32, %v3607_v49  ;;  %v1565_v49 = vand.u32 4294901760, %v1564_v6 }
 0x16f   : > { %1632 = vmatpush.msrb.mxu2 %v3639_v58  ;;  %1679 = vmatpush.msrb.mxu3 %v3605_v61  ;;  %v3740_v52 = vand.u32 4294901760, %v331_v17  ;;  %v596_v32 = vsel %vm592_vm5, %v3455_v3, %v3654_v62  ;;  %v4263_v3 = vand.u32 4294901760, %v3706_v36 }
 0x170   : > { %1323 = vmatmul.f32.vlgmr.msra.gmra.mxu0 %v3197_v54  ;;  %1468 = vmatmul.f32.vlgmr.msra.gmra.mxu3 %v3172_v5  ;;  %v3788_v19 = vand.u32 4294901760, %v596_v32 }
 0x171   : > { %1494 = vmatpush.msrb.mxu0 %v3651_v8  ;;  %1548 = vmatpush.msrb.mxu1 %v1547_v39  ;;  %v1553_v39 = vand.u32 4294901760, %v1552_v31  ;;  %v3749_v31 = vsub.f32 %v695_v1, %v3719_v0  ;;  %v1576_v1 = vsub.f32 %v3695_v14, %v4188_v23  ;;  %v3774_v63 = vsub.f32 %v331_v17, %v3740_v52  ;;  %v492_v6 = vpop.permute.xlu2 %491 }
 0x172   : > { %1635 = vmatpush.msrb.mxu2 %v3665_v60  ;;  %2438 = vset.pattern.permute.xlu2 %v2651_v13  ;;  %v3759_v13 = vsub.f32 %v364_v28, %v3729_v51  ;;  %v3771_v28 = vand.u32 4294901760, %v629_v12  ;;  %v1582_v62 = vsub.f32 %v3706_v36, %v4263_v3  ;;  %v563_v23 = vsel %vm559_vm4, %v3471_v11, %v558_v22 }
 0x173   : > { %1681 = vmatpush.msrb.mxu3 %v3631_v38  ;;  %795 = vperm.xlu2 %2438, %v791_v59   ;;  %v3751_v59 = vand.u32 4294901760, %v662_v57  ;;  %v1571_v17 = vand.u32 4294901760, %v1570_v29  ;;  %v530_v11 = vsel %vm526_vm6, %v3482_v42, %v525_v45  ;;  %v1577_v29 = vand.u32 4294901760, %v1576_v1  ;;  %v426_v45 = vpop.permute.xlu1 %425 }
 0x174   : > { %1364 = vmatmul.f32.vlgmr.msra.gmra.mxu1 %v3225_v16  ;;  %1496 = vmatpush.msrb.mxu0 %v3667_v48  ;;  %v459_v3 = vpop.permute.xlu0 %458  ;;  %v4265_v22 = vand.u32 4294901760, %v3733_v20  ;;  %v497_v42 = vsel %vm493_vm7, %v3488_v46, %v492_v6  ;;  %v4266_v1 = vand.u32 4294901760, %v3749_v31  ;;  %v4267_v46 = vand.u32 4294901760, %v3549_v25 }
 0x175   : > { %1554 = vmatpush.msrb.mxu1 %v1553_v39  ;;  %1638 = vmatpush.msrb.mxu2 %v3679_v18  ;;  %v3803_v39 = vsub.f32 %v629_v12, %v3771_v28  ;;  %v464_v12 = vsel %vm460_vm8, %v3510_v44, %v459_v3  ;;  %v4269_v25 = vand.u32 4294901760, %v3567_v24  ;;  %v431_v24 = vsel %vm427_vm9, %v3542_v9, %v426_v45 }
 0x176   : > { %1683 = vmatpush.msrb.mxu3 %v3651_v8  ;;  %1498 = vmatpush.msrb.mxu0 %v3671_v26 }
 0x177   : > { %1560 = vmatpush.msrb.mxu1 %v1559_v35  ;;  %1641 = vmatpush.msrb.mxu2 %v3695_v14  ;;  %v3782_v35 = vsub.f32 %v662_v57, %v3751_v59  ;;  %v4264_v57 = vand.u32 4294901760, %v3724_v27 }
 0x178   : > { %1685 = vmatpush.msrb.mxu3 %v3667_v48  ;;  %1500 = vmatpush.msrb.mxu0 %v3697_v33  ;;  %v3818_v48 = vsub.f32 %v596_v32, %v3788_v19 }
 0x179   : > { %1566 = vmatpush.msrb.mxu1 %v1565_v49  ;;  %1644 = vmatpush.msrb.mxu2 %v3706_v36  ;;  %v1861_v16 = vsub.f32 %v3724_v27, %v4264_v57  ;;  %v1588_v49 = vsub.f32 %v3733_v20, %v4265_v22  ;;  %v1583_v57 = vand.u32 4294901760, %v1582_v62  ;;  %v4268_v62 = vand.u32 4294901760, %v3759_v13 }
 0x17a   : > { %1687 = vmatpush.msrb.mxu3 %v3671_v26  ;;  %1502 = vmatpush.msrb.mxu0 %v3729_v51  ;;  %v3805_v26 = vand.u32 4294901760, %v563_v23  ;;  %v3829_v22 = vand.u32 4294901760, %v497_v42 }
 0x17b   : > { %1572 = vmatpush.msrb.mxu1 %v1571_v17  ;;  %1647 = vmatpush.msrb.mxu2 %v3733_v20  ;;  %v1867_v17 = vsub.f32 %v3749_v31, %v4266_v1  ;;  %v1594_v6 = vsub.f32 %v3759_v13, %v4268_v62  ;;  %v1862_v1 = vand.u32 4294901760, %v1861_v16  ;;  %v4271_v62 = vand.u32 4294901760, %v3782_v35 }
 0x17c   : > { %1689 = vmatpush.msrb.mxu3 %v3697_v33  ;;  %1504 = vmatpush.msrb.mxu0 %v3740_v52  ;;  %v3820_v33 = vand.u32 4294901760, %v530_v11  ;;  %v3832_v32 = vsub.f32 %v563_v23, %v3805_v26  ;;  %v360_v9 = vpop.permute.xlu0 %359 }
 0x17d   : > { %1578 = vmatpush.msrb.mxu1 %v1577_v29  ;;  %1650 = vmatpush.msrb.mxu2 %v3759_v13  ;;  %v1589_v29 = vand.u32 4294901760, %v1588_v49  ;;  %v1868_v16 = vand.u32 4294901760, %v1867_v17  ;;  %v4270_v49 = vand.u32 4294901760, %v3774_v63  ;;  %v1873_v44 = vsub.f32 %v3782_v35, %v4271_v62 }
 0x17e   : > { %1691 = vmatpush.msrb.mxu3 %v3729_v51  ;;  %1713 = vmatpush.msra.mxu0 %v4267_v46  ;;  %v4195_v46 = vand.u32 4294901760, %v3803_v39  ;;  %v3848_v3 = vsub.f32 %v530_v11, %v3820_v33  ;;  %v4194_v17 = vand.u32 4294901760, %v3818_v48  ;;  %v3860_v62 = vsub.f32 %v497_v42, %v3829_v22 }
 0x17f   : > { %1584 = vmatpush.msrb.mxu1 %v1583_v57  ;;  %1653 = vmatpush.msrb.mxu2 %v3774_v63  ;;  %v393_v57 = vpop.permute.xlu2 %392  ;;  %v1600_v23 = vsub.f32 %v3774_v63, %v4270_v49  ;;  %v4272_v49 = vand.u32 4294901760, %v3583_v50  ;;  %v1874_v42 = vand.u32 4294901760, %v1873_v44  ;;  %v4274_v44 = vand.u32 4294901760, %v3618_v2 }
 0x180   : > { %1693 = vmatpush.msrb.mxu3 %v3740_v52  ;;  %1717 = vmatpush.msra.mxu0 %v4269_v25  ;;  %v1595_v25 = vand.u32 4294901760, %v1594_v6  ;;  %v398_v11 = vsel %vm394_vm10, %v3577_v21, %v393_v57  ;;  %v1879_v45 = vsub.f32 %v3803_v39, %v4195_v46  ;;  %v1890_v6 = vand.u32 4294901760, %v3832_v32 }
 0x181   : > { %1813 = vmatpush.msra.mxu2 %v3683_v30  ;;  %1590 = vmatpush.msrb.mxu1 %v1589_v29  ;;  %v3854_v29 = vand.u32 4294901760, %v464_v12  ;;  %v1601_v50 = vand.u32 4294901760, %v1600_v23  ;;  %v1885_v21 = vsub.f32 %v3818_v48, %v4194_v17  ;;  %v1896_v57 = vand.u32 4294901760, %v3848_v3  ;;  %v327_v23 = vpop.permute.xlu1 %326 }
 0x182   : > { %1863 = vmatpush.msra.mxu3 %v1862_v1  ;;  %1434 = vmatmul.f32.gmra.mxu2 %v3384_v10  ;;  %v3868_v1 = vand.u32 4294901760, %v431_v24  ;;  %v1891_v17 = vsub.f32 %v3832_v32, %v1890_v6  ;;  %v1902_v46 = vand.u32 4294901760, %v3860_v62  ;;  %v4275_v2 = vand.u32 4294901760, %v3639_v58 }
 0x183   : > { %1721 = vmatpush.msra.mxu0 %v4272_v49  ;;  %1815 = vmatpush.msra.mxu2 %v3719_v0  ;;  %v4273_v49 = vand.u32 4294901760, %v3595_v56  ;;  %v365_v56 = vsel %vm361_vm12, %v3625_v47, %v360_v9  ;;  %v332_v47 = vsel %vm328_vm13, %v3685_v4, %v327_v23  ;;  %v4276_v4 = vand.u32 4294901760, %v3665_v60 }
 0x184   : > { %1596 = vmatpush.msrb.mxu1 %v1595_v25  ;;  %1869 = vmatpush.msra.mxu3 %v1868_v16  ;;  %v3879_v16 = vand.u32 4294901760, %v398_v11  ;;  %v3882_v25 = vsub.f32 %v464_v12, %v3854_v29  ;;  %v3894_v12 = vsub.f32 %v431_v24, %v3868_v1  ;;  %v3900_v9 = vand.u32 4294901760, %v365_v56 }
 0x185   : > { %1328 = vmatmul.f32.gmra.mxu0 %v3410_v7  ;;  %1472 = vmatmul.f32.gmra.mxu3 %v3384_v10  ;;  %v1892_v58 = vand.u32 4294901760, %v1891_v17  ;;  %v4277_v60 = vand.u32 4294901760, %v3679_v18  ;;  %v4278_v18 = vand.u32 4294901760, %v3695_v14 }
 0x186   : > { %1725 = vmatpush.msra.mxu0 %v4273_v49  ;;  %1817 = vmatpush.msra.mxu2 %v3751_v59  ;;  %v1880_v49 = vand.u32 4294901760, %v1879_v45  ;;  %v1886_v45 = vand.u32 4294901760, %v1885_v21  ;;  %v3908_v24 = vsub.f32 %v398_v11, %v3879_v16  ;;  %v3918_v21 = vand.u32 4294901760, %v332_v47 }
 0x187   : > { %1602 = vmatpush.msrb.mxu1 %v1601_v50  ;;  %1875 = vmatpush.msra.mxu3 %v1874_v42  ;;  %v1897_v50 = vsub.f32 %v3848_v3, %v1896_v57  ;;  %v1903_v42 = vsub.f32 %v3860_v62, %v1902_v46  ;;  %v3924_v11 = vsub.f32 %v365_v56, %v3900_v9 }
 0x188   : > { %1370 = vmatmul.f32.gmra.mxu1 %v3433_v43  ;;  %1729 = vmatpush.msra.mxu0 %v4274_v44  ;;  %v1920_v23 = vand.u32 4294901760, %v3908_v24  ;;  %v3936_v44 = vsub.f32 %v332_v47, %v3918_v21 }
 0x189   : > { %1775 = vmatpush.msra.mxu1 %v3530_v15  ;;  %1819 = vmatpush.msra.mxu2 %v3771_v28  ;;  %v1908_v15 = vand.u32 4294901760, %v3882_v25  ;;  %v1898_v17 = vand.u32 4294901760, %v1897_v50  ;;  %v1904_v56 = vand.u32 4294901760, %v1903_v42  ;;  %v4283_v42 = vand.u32 4294901760, %v3774_v63 }
 0x18a   : > { %1881 = vmatpush.msra.mxu3 %v1880_v49  ;;  %1733 = vmatpush.msra.mxu0 %v4275_v2  ;;  %v1926_v49 = vand.u32 4294901760, %v3924_v11  ;;  %v4279_v2 = vand.u32 4294901760, %v3706_v36  ;;  %v1921_v14 = vsub.f32 %v3908_v24, %v1920_v23  ;;  %v1932_v50 = vand.u32 4294901760, %v3936_v44 }
 0x18b   : > { %1777 = vmatpush.msra.mxu1 %v3544_v34  ;;  %1821 = vmatpush.msra.mxu2 %v3788_v19  ;;  %v1914_v34 = vand.u32 4294901760, %v3894_v12  ;;  %v4286_v63 = vand.u32 4294901760, %v3724_v27 }
 0x18c   : > { %1887 = vmatpush.msra.mxu3 %v1886_v45  ;;  %1737 = vmatpush.msra.mxu0 %v4276_v4  ;;  %v1927_v36 = vsub.f32 %v3924_v11, %v1926_v49  ;;  %v4281_v4 = vand.u32 4294901760, %v3759_v13  ;;  %v4285_v13 = vld [vmem:[#allocation29_spill] sm:$0xff] }
 0x18d   : > { %1779 = vmatpush.msra.mxu1 %v3557_v37  ;;  %1823 = vmatpush.msra.mxu2 %v3805_v26  ;;  %v1909_v37 = vsub.f32 %v3882_v25, %v1908_v15 }
 0x18e   : > { %1893 = vmatpush.msra.mxu3 %v1892_v58  ;;  %1741 = vmatpush.msra.mxu0 %v4277_v60  ;;  %v1928_v58 = vand.u32 4294901760, %v1927_v36  ;;  %v4284_v60 = vld [vmem:[#allocation22_spill] sm:$0xff] }
 0x18f   : > { %1781 = vmatpush.msra.mxu1 %v3569_v55  ;;  %1825 = vmatpush.msra.mxu2 %v3820_v33  ;;  %v1915_v55 = vsub.f32 %v3894_v12, %v1914_v34  ;;  %v1910_v47 = vand.u32 4294901760, %v1909_v37  ;;  %v4288_v37 = vand.u32 4294901760, %v3749_v31 }
 0x190   : > { %1899 = vmatpush.msra.mxu3 %v1898_v17  ;;  %1510 = vmatmul.f32.vlgmr.msrb.gmra.mxu0 %v4252_v53  ;;  %v4287_v17 = vld [vmem:[#allocation23_spill] sm:$0xff] }
 0x191   : > { %1745 = vmatpush.msra.mxu0 %v4278_v18  ;;  %1783 = vmatpush.msra.mxu1 %v3592_v40  ;;  %v4280_v40 = vand.u32 4294901760, %v3733_v20  ;;  %v1916_v45 = vand.u32 4294901760, %v1915_v55  ;;  %v4282_v20 = vld [vmem:[#allocation26_spill] sm:$0xff] }
 0x192   : > { %1827 = vmatpush.msra.mxu2 %v3829_v22  ;;  %1905 = vmatpush.msra.mxu3 %v1904_v56 }
 0x193   : > { %1604 = vmatmul.f32.vlgmr.msrb.gmra.mxu1 %v3172_v5  ;;  %1749 = vmatpush.msra.mxu0 %v4279_v2 }
 0x194   : > { %1785 = vmatpush.msra.mxu1 %v3605_v61  ;;  %1829 = vmatpush.msra.mxu2 %v3854_v29  ;;  %v1922_v61 = vand.u32 4294901760, %v1921_v14 }
 0x195   : > { %1911 = vmatpush.msra.mxu3 %v1910_v47  ;;  %1753 = vmatpush.msra.mxu0 %v4280_v40 }
 0x196   : > { %1787 = vmatpush.msra.mxu1 %v3631_v38  ;;  %1831 = vmatpush.msra.mxu2 %v3868_v1  ;;  %v1933_v38 = vsub.f32 %v3936_v44, %v1932_v50 }
 0x197   : > { %1917 = vmatpush.msra.mxu3 %v1916_v45  ;;  %1656 = vmatmul.f32.vlgmr.msrb.gmra.mxu2 %v3197_v54 }
 0x198   : > { %1757 = vmatpush.msra.mxu0 %v4281_v4  ;;  %1789 = vmatpush.msra.mxu1 %v3651_v8  ;;  %v1934_v8 = vand.u32 4294901760, %v1933_v38 }
 0x199   : > { %1833 = vmatpush.msra.mxu2 %v3879_v16  ;;  %1923 = vmatpush.msra.mxu3 %v1922_v61 }
 0x19a   : > { %1518 = vmatmul.f32.gmra.mxu0 %v3462_v41  ;;  %1697 = vmatmul.f32.vlgmr.msrb.gmra.mxu3 %v4282_v20 }
 0x19b   : > { %1761 = vmatpush.msra.mxu0 %v4283_v42  ;;  %1791 = vmatpush.msra.mxu1 %v4284_v60 }
 0x19c   : > { %1835 = vmatpush.msra.mxu2 %v3900_v9  ;;  %1929 = vmatpush.msra.mxu3 %v1928_v58 }
 0x19d   : > { %1950 = vmatpush.msrb.mxu0 %v3724_v27  ;;  %1608 = vmatmul.f32.gmra.mxu1 %v3384_v10  ;;  %v4289_v27 = vand.u32 4294901760, %v3782_v35 }
 0x19e   : > { %1793 = vmatpush.msra.mxu1 %v4285_v13  ;;  %1837 = vmatpush.msra.mxu2 %v3918_v21 }
 0x19f   : > { %1935 = vmatpush.msra.mxu3 %v1934_v8  ;;  %1953 = vmatpush.msrb.mxu0 %v3749_v31  ;;  %v4291_v31 = vand.u32 4294901760, %v3818_v48 }
 0x1a0   : > { %2046 = vmatpush.msrb.mxu2 %v4286_v63  ;;  %1795 = vmatpush.msra.mxu1 %v4287_v17 }
 0x1a1   : > { %2108 = vmatpush.msrb.mxu3 %v3683_v30  ;;  %1956 = vmatpush.msrb.mxu0 %v3782_v35 }
 0x1a2   : > { %2050 = vmatpush.msrb.mxu2 %v4288_v37  ;;  %1797 = vmatpush.msra.mxu1 %v3729_v51  ;;  %v4290_v51 = vand.u32 4294901760, %v3803_v39 }
 0x1a3   : > { %1661 = vmatmul.f32.gmra.mxu2 %v3410_v7  ;;  %2110 = vmatpush.msrb.mxu3 %v3719_v0 }
 0x1a4   : > { %1959 = vmatpush.msrb.mxu0 %v3803_v39  ;;  %2054 = vmatpush.msrb.mxu2 %v4289_v27 }
 0x1a5   : > { %1703 = vmatmul.f32.gmra.mxu3 %v3433_v43  ;;  %1763 = vmatmul.f32.vlgmr.msra.gmra.mxu0 %v3172_v5 }
 0x1a6   : > { %1799 = vmatpush.msra.mxu1 %v3740_v52  ;;  %2112 = vmatpush.msrb.mxu3 %v3751_v59 }
 0x1a7   : > { %1962 = vmatpush.msrb.mxu0 %v3818_v48  ;;  %2058 = vmatpush.msrb.mxu2 %v4290_v51 }
 0x1a8   : > { %2002 = vmatpush.msrb.mxu1 %v3683_v30  ;;  %2114 = vmatpush.msrb.mxu3 %v3771_v28 }
 0x1a9   : > { %1801 = vmatmul.f32.vlgmr.msra.gmra.mxu1 %v3172_v5  ;;  %1965 = vmatpush.msrb.mxu0 %v3832_v32 }
 0x1aa   : > { %2004 = vmatpush.msrb.mxu1 %v3719_v0  ;;  %2062 = vmatpush.msrb.mxu2 %v4291_v31  ;;  %v991_v0 = vpop.f32.mrf.mxu2 }
 0x1ab   : > { %2116 = vmatpush.msrb.mxu3 %v3788_v19  ;;  %1968 = vmatpush.msrb.mxu0 %v3848_v3 }
 0x1ac   : > { %2006 = vmatpush.msrb.mxu1 %v3751_v59  ;;  %2066 = vmatpush.msrb.mxu2 %v1890_v6 }
 0x1ad   : > { %1843 = vmatmul.f32.vlgmr.msra.gmra.mxu2 %v4252_v53  ;;  %2118 = vmatpush.msrb.mxu3 %v3805_v26 }
 0x1ae   : > { %1971 = vmatpush.msrb.mxu0 %v3860_v62  ;;  %2008 = vmatpush.msrb.mxu1 %v3771_v28 }
 0x1af   : > { %2070 = vmatpush.msrb.mxu2 %v1896_v57  ;;  %1767 = vmatmul.f32.gmra.mxu0 %v3384_v10 }
 0x1b0   : > { %1937 = vmatmul.f32.vlgmr.msra.gmra.mxu3 %v3172_v5  ;;  %1974 = vmatpush.msrb.mxu0 %v3882_v25 }
 0x1b1   : > { %2120 = vmatpush.msrb.mxu3 %v3820_v33  ;;  %2010 = vmatpush.msrb.mxu1 %v3788_v19  ;;  %v939_v53 = vpop.f32.mrf.mxu1 }
 0x1b2   : > { %2074 = vmatpush.msrb.mxu2 %v1902_v46  ;;  %1805 = vmatmul.f32.gmra.mxu1 %v3384_v10 }
 0x1b3   : > { %2122 = vmatpush.msrb.mxu3 %v3829_v22  ;;  %1977 = vmatpush.msrb.mxu0 %v3894_v12 }
 0x1b4   : > { %2012 = vmatpush.msrb.mxu1 %v3805_v26  ;;  %2078 = vmatpush.msrb.mxu2 %v1908_v15 }
 0x1b5   : > { %2124 = vmatpush.msrb.mxu3 %v3854_v29  ;;  %1980 = vmatpush.msrb.mxu0 %v3908_v24 }
 0x1b6   : > { %2014 = vmatpush.msrb.mxu1 %v3820_v33  ;;  %2082 = vmatpush.msrb.mxu2 %v1914_v34 }
 0x1b7   : > { %1851 = vmatmul.f32.gmra.mxu2 %v3462_v41  ;;  %2126 = vmatpush.msrb.mxu3 %v3868_v1  ;;  %v845_v41 = vpop.f32.mrf.mxu0 }
 0x1b8   : > { %1983 = vmatpush.msrb.mxu0 %v3924_v11  ;;  %2016 = vmatpush.msrb.mxu1 %v3829_v22 }
 0x1b9   : > { %2086 = vmatpush.msrb.mxu2 %v1920_v23  ;;  %1941 = vmatmul.f32.gmra.mxu3 %v3384_v10 }
 0x1ba   : > { %2128 = vmatpush.msrb.mxu3 %v3879_v16  ;;  %1986 = vmatpush.msrb.mxu0 %v3936_v44 }
 0x1bb   : > { %2018 = vmatpush.msrb.mxu1 %v3854_v29  ;;  %2090 = vmatpush.msrb.mxu2 %v1926_v49 }
 0x1bc   : > { %1989 = vmatmul.f32.vlgmr.msrb.gmra.mxu0 %v3197_v54  ;;  %2130 = vmatpush.msrb.mxu3 %v3900_v9 }
 0x1bd   : > { %2020 = vmatpush.msrb.mxu1 %v3868_v1  ;;  %2094 = vmatpush.msrb.mxu2 %v1932_v50 }
 0x1be   : > { %2132 = vmatpush.msrb.mxu3 %v3918_v21 }
 0x1bf   : > { %2022 = vmatpush.msrb.mxu1 %v3879_v16  ;;  %2096 = vmatmul.f32.vlgmr.msrb.gmra.mxu2 %v3172_v5 }
 0x1c1   : > { %2024 = vmatpush.msrb.mxu1 %v3900_v9  ;;  %2134 = vmatmul.f32.vlgmr.msrb.gmra.mxu3 %v3172_v5 }
 0x1c3   : > { %2026 = vmatpush.msrb.mxu1 %v3918_v21  ;;  %v853_v54 = vpop.f32.mrf.mxu0 }
 0x1c4   : > { %1994 = vmatmul.f32.gmra.mxu0 %v3410_v7  ;;  %2030 = vmatmul.f32.vlgmr.msrb.gmra.mxu1 %v4282_v20 }
 0x1c5   : > { %v1032_v26 = vpop.f32.mrf.mxu3 }
 0x1c6   : > { %v943_v48 = vpop.f32.mrf.mxu1 }
 0x1c7   : > { %2100 = vmatmul.f32.gmra.mxu2 %v3384_v10 }
 0x1c9   : > { %2138 = vmatmul.f32.gmra.mxu3 %v3384_v10 }
 0x1cc   : > { %2036 = vmatmul.f32.gmra.mxu1 %v3433_v43 }
 0x1cd   : > { %v4065_v30 = vpop.permute.xlu2 %795  ;;  %v1098_v7 = vpop.f32.mrf.mxu0 }
 0x1ce   : > { %v846_v5 = vadd.f32 %v845_v41, %v4065_v30 }
 0x1cf   : > { %v1136_v39 = vpop.f32.mrf.mxu1 }
 0x1d0   : > { %v940_v33 = vadd.f32 %v939_v53, %v846_v5 }
 0x1d2   : > { %v992_v52 = vadd.f32 %v991_v0, %v940_v33  ;;  %v996_v59 = vpop.f32.mrf.mxu2 }
 0x1d4   : > { %v1033_v19 = vadd.f32 %v1032_v26, %v992_v52 }
 0x1d5   : > { %v1038_v28 = vpop.f32.mrf.mxu3 }
 0x1d6   : > { %v1099_v35 = vadd.f32 %v1098_v7, %v1033_v19 }
 0x1d8   : > { %v1137_v10 = vadd.f32 %v1136_v39, %v1099_v35 }
 0x1da   : > { %v2142_v22 = vmax.f32 %v1137_v10, 0.0 }
 0x1dc   : > { %2150 = vst [vmem:[%s4069_s14] sm:$0xff] %v2142_v22  ;;  %v4072_v43 = vpop.permute.xlu0 %800  ;;  %v1178_v46 = vpop.f32.mrf.mxu2 }
 0x1dd   : > { %v854_v32 = vadd.f32 %v853_v54, %v4072_v43  ;;  %v1179_v25 = vadd.f32 %v1178_v46, %v4065_v30 }
 0x1de   : > { %v1272_v29 = vpop.f32.mrf.mxu3 }
 0x1df   : > { %v944_v3 = vadd.f32 %v943_v48, %v854_v32  ;;  %v1273_v21 = vadd.f32 %v1272_v29, %v1179_v25 }
 0x1e1   : > { %v997_v62 = vadd.f32 %v996_v59, %v944_v3 }
 0x1e2   : > { %v1102_v6 = vpop.f32.mrf.mxu0 }
 0x1e3   : > { %v1039_v1 = vadd.f32 %v1038_v28, %v997_v62 }
 0x1e5   : > { %v1103_v57 = vadd.f32 %v1102_v6, %v1039_v1  ;;  %v1140_v16 = vpop.f32.mrf.mxu1  ;;  %v1186_v9 = vpop.f32.mrf.mxu2 }
 0x1e6   : > { %v1187_v47 = vadd.f32 %v1186_v9, %v4072_v43 }
 0x1e7   : > { %v1141_v12 = vadd.f32 %v1140_v16, %v1103_v57 }
 0x1e8   : > { %v1276_v15 = vpop.f32.mrf.mxu3 }
 0x1e9   : > { %v2146_v24 = vmax.f32 %v1141_v12, 0.0  ;;  %v1277_v14 = vadd.f32 %v1276_v15, %v1187_v47 }
 0x1eb   : > { %2154 = vst [vmem:[%s4069_s14 + $0x20] sm:$0xff] %v2146_v24 }
 0x1ed   : > { %v1324_v34 = vpop.f32.mrf.mxu0 }
 0x1ee   : > { %v1325_v11 = vadd.f32 %v1324_v34, %v1273_v21 }
 0x1f0   : > { %v1431_v56 = vpop.f32.mrf.mxu2 }
 0x1f1   : > { %v1365_v23 = vpop.f32.mrf.mxu1 }
 0x1f2   : > { %v1366_v44 = vadd.f32 %v1365_v23, %v1325_v11 }
 0x1f3   : > { %v1469_v18 = vpop.f32.mrf.mxu3 }
 0x1f4   : > { %v1432_v55 = vadd.f32 %v1431_v56, %v1366_v44 }
 0x1f6   : > { %v1470_v49 = vadd.f32 %v1469_v18, %v1432_v55 }
 0x1f8   : > { %v2143_v2 = vmax.f32 %v1470_v49, 0.0 }
 0x1fa   : > { %2151 = vst [vmem:[%s4069_s14 + $0x8] sm:$0xff] %v2143_v2 }
 0x202   : > { %v1329_v40 = vpop.f32.mrf.mxu0 }
 0x203   : > { %v1330_v45 = vadd.f32 %v1329_v40, %v1277_v14 }
 0x205   : > { %v1371_v50 = vpop.f32.mrf.mxu1  ;;  %v1435_v36 = vpop.f32.mrf.mxu2 }
 0x206   : > { %v1372_v61 = vadd.f32 %v1371_v50, %v1330_v45 }
 0x208   : > { %v1436_v4 = vadd.f32 %v1435_v36, %v1372_v61  ;;  %v1473_v38 = vpop.f32.mrf.mxu3 }
 0x20a   : > { %v1474_v20 = vadd.f32 %v1473_v38, %v1436_v4 }
 0x20c   : > { %v2147_v58 = vmax.f32 %v1474_v20, 0.0 }
 0x20d   : > { %v1511_v42 = vpop.f32.mrf.mxu0 }
 0x20e   : > { %2155 = vst [vmem:[%s4069_s14 + $0x28] sm:$0xff] %v2147_v58  ;;  %v1512_v8 = vadd.f32 %v1511_v42, %v4065_v30 }
 0x210   : > { %v1605_v60 = vpop.f32.mrf.mxu1 }
 0x211   : > { %v1606_v13 = vadd.f32 %v1605_v60, %v1512_v8 }
 0x217   : > { %v1519_v63 = vpop.f32.mrf.mxu0 }
 0x218   : > { %v1520_v31 = vadd.f32 %v1519_v63, %v4072_v43 }
 0x21a   : > { %v1657_v17 = vpop.f32.mrf.mxu2  ;;  %v1609_v37 = vpop.f32.mrf.mxu1 }
 0x21b   : > { %v1658_v27 = vadd.f32 %v1657_v17, %v1606_v13  ;;  %v1610_v54 = vadd.f32 %v1609_v37, %v1520_v31 }
 0x21d   : > { %v1698_v51 = vpop.f32.mrf.mxu3 }
 0x21e   : > { %v1699_v41 = vadd.f32 %v1698_v51, %v1658_v27 }
 0x222   : > { %v1764_v53 = vpop.f32.mrf.mxu0 }
 0x223   : > { %v1765_v0 = vadd.f32 %v1764_v53, %v1699_v41 }
 0x226   : > { %v1802_v48 = vpop.f32.mrf.mxu1  ;;  %v1662_v5 = vpop.f32.mrf.mxu2 }
 0x227   : > { %v1803_v26 = vadd.f32 %v1802_v48, %v1765_v0  ;;  %v1663_v33 = vadd.f32 %v1662_v5, %v1610_v54 }
 0x228   : > { %v1704_v7 = vpop.f32.mrf.mxu3 }
 0x229   : > { %v2144_v52 = vmax.f32 %v1803_v26, 0.0  ;;  %v1705_v59 = vadd.f32 %v1704_v7, %v1663_v33 }
 0x22b   : > { %2152 = vst [vmem:[%s4069_s14 + $0x10] sm:$0xff] %v2144_v52 }
 0x22c   : > { %v1768_v19 = vpop.f32.mrf.mxu0 }
 0x22d   : > { %v1769_v39 = vadd.f32 %v1768_v19, %v1705_v59 }
 0x22f   : > { %v1806_v28 = vpop.f32.mrf.mxu1 }
 0x230   : > { %v1807_v35 = vadd.f32 %v1806_v28, %v1769_v39  ;;  %v1844_v10 = vpop.f32.mrf.mxu2 }
 0x231   : > { %v1845_v46 = vadd.f32 %v1844_v10, %v4065_v30 }
 0x232   : > { %v2148_v22 = vmax.f32 %v1807_v35, 0.0 }
 0x233   : > { %v1938_v32 = vpop.f32.mrf.mxu3 }
 0x234   : > { %2156 = vst [vmem:[%s4069_s14 + $0x30] sm:$0xff] %v2148_v22  ;;  %v1939_v6 = vadd.f32 %v1938_v32, %v1845_v46 }
 0x239   : > { %v1990_v29 = vpop.f32.mrf.mxu0 }
 0x23a   : > { %v1852_v3 = vpop.f32.mrf.mxu2  ;;  %v1991_v1 = vadd.f32 %v1990_v29, %v1939_v6 }
 0x23b   : > { %v1853_v16 = vadd.f32 %v1852_v3, %v4072_v43 }
 0x23c   : > { %v1942_v62 = vpop.f32.mrf.mxu3 }
 0x23d   : > { %v1943_v21 = vadd.f32 %v1942_v62, %v1853_v16 }
 0x241   : > { %v2031_v57 = vpop.f32.mrf.mxu1  ;;  %v1995_v15 = vpop.f32.mrf.mxu0 }
 0x242   : > { %v2032_v25 = vadd.f32 %v2031_v57, %v1991_v1  ;;  %v2097_v12 = vpop.f32.mrf.mxu2  ;;  %v1996_v34 = vadd.f32 %v1995_v15, %v1943_v21 }
 0x244   : > { %v2098_v9 = vadd.f32 %v2097_v12, %v2032_v25  ;;  %v2135_v24 = vpop.f32.mrf.mxu3 }
 0x246   : > { %v2136_v30 = vadd.f32 %v2135_v24, %v2098_v9 }
 0x248   : > { %v2145_v11 = vmax.f32 %v2136_v30, 0.0 }
 0x249   : > { %v2037_v23 = vpop.f32.mrf.mxu1 }
 0x24a   : > { %2153 = vst [vmem:[%s4069_s14 + $0x18] sm:$0xff] %v2145_v11  ;;  %v2038_v43 = vadd.f32 %v2037_v23, %v1996_v34  ;;  %v2101_v56 = vpop.f32.mrf.mxu2 }
 0x24c   : > { %v2102_v44 = vadd.f32 %v2101_v56, %v2038_v43  ;;  %v2139_v18 = vpop.f32.mrf.mxu3 }
 0x24e   : > { %v2140_v55 = vadd.f32 %v2139_v18, %v2102_v44 }
 0x250   : > { %v2149_v49 = vmax.f32 %v2140_v55, 0.0 }
 0x252   : > { %2157 = vst [vmem:[%s4069_s14 + $0x38] sm:$0xff] %v2149_v49 }
 0x253   : > { %2534 = shalt.err (!%p2531_p6)
}
 0x254   : > { %s2652_s8 = smov 512   ;;  %s2653_s14 = smov 1024  }
 0x255   : > { %2327 = dma.vmem_to_hbm [thread:$0]  (%p2810_p4), %s2174_s11, 1024, %s2176_s12, %s2159_s28, %s2652_s8, %s2653_s14, %s2640_s13  }
 0x256 PF: > { %s4294_s6 = sld [smem:[#allocation13_spill]]  ;;  %p2333_p10 = scmp.ge.s32.totalorder %s2635_s25, 2 }
 0x258   : > { %p2330_p11 = pnand %p2333_p10, %p2819_p9 }
 0x25a   : > { %p2331_p12 = pneg %p2330_p11 }
 0x25c   : > { %s2190_s26 = sand.u32 1, %s4294_s6  }
 0x25d   : > { %s2191_s7 = scalar_lea.sflag [#allocation6], %s2190_s26 }
 0x25e   : > { %2588 = dma.done.wait (%p2331_p12), %s2191_s7, 1024  }
 0x25f   : > { %2590 = vsyncadd (%p2331_p12), %s2191_s7, 4294966272  ;;  %s23_s25 = sadd.s32 1, %s2635_s25   ;;  %s4296_s27 = sld [smem:[#allocation20_spill]] }
 0x260   : > { %p20_p8 = scmp.ge.s32.totalorder %s23_s25, 6   ;;  %s4297_s13 = sld [smem:[#allocation14_spill]] }
 0x261   : > { %s4298_s20 = sld [smem:[#allocation19_spill]]  ;;  %s4302_s15 = smov %s2599_s16 }
 0x262   : > { %s4299_s21 = sld [smem:[#allocation16_spill]]  ;;  %s4303_s16 = smov %s2603_s17 }
 0x263   : > { %s4300_s23 = sld [smem:[#allocation17_spill]]  ;;  %s4305_s18 = smov %s2611_s19 }
 0x264   : > { %s4301_s10 = sld [smem:[#allocation18_spill]]  ;;  %s4307_s22 = smov %s2631_s24 }
 0x265   : > { %s4304_s17 = smov %s4296_s27 }
 0x266   : > { %s4306_s19 = smov %s4297_s13  ;;  %22 = sbr.rel (!%p20_p8) target bundleno = 13 (0xd), region = 94 }
 0x26a   : > { %s4308_s24 = smov %s4301_s10 }
 0x26b   :  { %2197 = vsyncpa [#allocation5], 1 }
 0x26c   :  { %2199 = vsyncpa [#allocation5 + $0x1], 1 }
 0x26d   :  { %2200 = vsyncpa [#allocation8], 1 }
 0x26e   :  { %2202 = vsyncpa [#allocation8 + $0x1], 1 }
 0x26f   :  { %2203 = vsyncpa [#allocation6], 1 }
 0x270   :  { %2205 = vsyncpa [#allocation6 + $0x1], 1 }

</bundles_post_ra>
